<compile_context>
chip_gen: v7x
topology: tpu7x:2x2x1
jax: 0.10.0
libtpu: 0.0.40
codegen_flags: <defaults>
</compile_context>

<pallas_src>
import functools

import jax
import jax.numpy as jnp
from jax import lax
from jax.experimental import pallas as pl
from jax.experimental.pallas import tpu as pltpu

_SCHUNK = 128  # source rows per inner step (lane-aligned slice of the flat volume)


def _round_up(x, m):
    return (x + m - 1) // m * m


def _pick_tile(S):
    """Lane-dense output tile: multiple of 128, >=2 tiles when possible (v7x has 2 TCs)."""
    s128 = _round_up(S, 128)
    if s128 <= 128:
        return 128
    if s128 <= 1024:
        return _round_up(s128 // 2, 128)
    return 512


def _warp_kernel(tile_ref, chunk_ref, bounds_ref, flow_ref, src_ref, o_ref,
                 *, H, W, T, schunk):
    # tile_ref  : SMEM (n_tiles*2,)        [d_base, rem_base] of each output tile
    # chunk_ref : SMEM (n_chunks*2,)       [d_base, rem_base] of each source chunk
    # bounds_ref: SMEM (N*n_tiles*2,)      [c_lo, c_hi] contributing-chunk range
    # flow_ref  : VMEM (3, T)   f32        displacement of this output tile
    # src_ref   : VMEM (C, S_src)          full (padded) source volume of this batch
    # o_ref     : VMEM (C, T)              warped output tile (src dtype)
    HW = H * W
    C = src_ref.shape[0]
    n_idx = pl.program_id(0)
    t_idx = pl.program_id(1)
    n_tiles = pl.num_programs(1)

    # ---- scalar metadata (SMEM) -------------------------------------------
    d_base = tile_ref[2 * t_idx].astype(jnp.float32)
    r_base = tile_ref[2 * t_idx + 1].astype(jnp.float32)
    boff = 2 * (n_idx * n_tiles + t_idx)
    c_lo = bounds_ref[boff]
    c_hi = bounds_ref[boff + 1]

    # ---- base voxel coordinates of this tile, generated in-kernel ----------
    # linear index = t_idx*T + i = d_base*HW + (r_base + i); r stays < HW + T so the
    # float decomposition below is exact (the +0.5 nudge keeps floor robust).
    i_loc = lax.broadcasted_iota(jnp.int32, (1, T), 1).astype(jnp.float32)
    r = r_base + i_loc
    d_off = jnp.floor((r + 0.5) / HW)
    rem = r - d_off * HW
    gh = jnp.floor((rem + 0.5) / W)
    gw = rem - gh * W
    gd = d_base + d_off

    pos_d = gd + flow_ref[0:1, :]                     # (1, T) sample coords (voxels)
    pos_h = gh + flow_ref[1:2, :]
    pos_w = gw + flow_ref[2:3, :]

    # ---- loop over the source chunks that can contribute to this tile ------
    def chunk_body(c, acc):
        start = pl.multiple_of(c * schunk, schunk)
        src_chunk = src_ref[:, pl.ds(start, schunk)]              # (C, schunk)

        sd_base = chunk_ref[2 * c].astype(jnp.float32)
        sr_base = chunk_ref[2 * c + 1].astype(jnp.float32)
        i_s = lax.broadcasted_iota(jnp.int32, (schunk, 1), 0).astype(jnp.float32)
        sr = sr_base + i_s                                         # < HW + schunk
        sdo = jnp.floor((sr + 0.5) / HW)
        srem = sr - sdo * HW
        sh = jnp.floor((srem + 0.5) / W)
        sw = srem - sh * W
        sd = sd_base + sdo                                         # (schunk, 1)

        # Separable tent weights: relu(1 - |s_x - pos_x|) is exactly the linear
        # interpolation weight along each axis and is 0 for every out-of-range
        # corner, reproducing grid_sample's padding_mode='zeros'.
        wmat = jnp.maximum(1.0 - jnp.abs(sd - pos_d), 0.0)         # (schunk, T)
        wmat = wmat * jnp.maximum(1.0 - jnp.abs(sh - pos_h), 0.0)
        wmat = wmat * jnp.maximum(1.0 - jnp.abs(sw - pos_w), 0.0)

        return acc + jnp.dot(src_chunk, wmat.astype(src_chunk.dtype),
                             preferred_element_type=jnp.float32)

    acc0 = jnp.zeros((C, T), jnp.float32)
    acc = lax.fori_loop(c_lo, c_hi + 1, chunk_body, acc0)
    o_ref[...] = acc.astype(o_ref.dtype)


def spatial_transformer_forward(src, flow):
    """Pallas SpatialTransformer.forward (3-D volumes, bilinear, zeros padding).

    src : (N, C, D, H, W) source volume (output keeps src.dtype)
    flow: (N, 3, D, H, W) displacement field in voxel units
    """
    N, C, D, H, W = src.shape
    assert flow.shape == (N, 3, D, H, W), flow.shape
    HW = H * W
    S = D * H * W

    T = _pick_tile(S)
    n_tiles = -(-S // T)
    S_out = n_tiles * T
    n_chunks = -(-S // _SCHUNK)
    S_src = n_chunks * _SCHUNK

    src_flat = src.reshape(N, C, S)
    if S_src != S:
        src_flat = jnp.pad(src_flat, ((0, 0), (0, 0), (0, S_src - S)))
    flow_flat = flow.reshape(N, 3, S).astype(jnp.float32)
    if S_out != S:
        flow_flat = jnp.pad(flow_flat, ((0, 0), (0, 0), (0, S_out - S)))

    # Host-built per-tile / per-chunk (d_base, rem_base) tables (tiny, SMEM).
    tile_base = jnp.asarray(
        [v for t in range(n_tiles) for v in ((t * T) // HW, (t * T) % HW)],
        dtype=jnp.int32)
    chunk_base = jnp.asarray(
        [v for c in range(n_chunks) for v in ((c * _SCHUNK) // HW, (c * _SCHUNK) % HW)],
        dtype=jnp.int32)

    # Cheap device-side pre-reduction over flow: per output tile, the range of
    # source chunks that can hold a non-zero interpolation weight.
    lin = jnp.arange(S, dtype=jnp.int32)
    gd = lin // HW
    rem = lin - gd * HW
    gh = rem // W
    gw = rem - gh * W
    base = jnp.stack([gd, gh, gw]).astype(jnp.float32)[None]           # (1, 3, S)
    pos = base + flow.reshape(N, 3, S).astype(jnp.float32)             # (N, 3, S)
    low = jnp.floor(pos).astype(jnp.int32)
    flat_lo = (jnp.clip(low[:, 0], 0, D - 1) * HW
               + jnp.clip(low[:, 1], 0, H - 1) * W
               + jnp.clip(low[:, 2], 0, W - 1))
    hi = low + 1
    flat_hi = (jnp.clip(hi[:, 0], 0, D - 1) * HW
               + jnp.clip(hi[:, 1], 0, H - 1) * W
               + jnp.clip(hi[:, 2], 0, W - 1))
    if S_out != S:
        flat_lo = jnp.pad(flat_lo, ((0, 0), (0, S_out - S)),
                          constant_values=jnp.iinfo(jnp.int32).max)
        flat_hi = jnp.pad(flat_hi, ((0, 0), (0, S_out - S)), constant_values=0)
    c_lo = jnp.clip(jnp.min(flat_lo.reshape(N, n_tiles, T), axis=-1) // _SCHUNK,
                    0, n_chunks - 1)
    c_hi = jnp.clip(jnp.max(flat_hi.reshape(N, n_tiles, T), axis=-1) // _SCHUNK,
                    0, n_chunks - 1)
    bounds = jnp.stack([c_lo, c_hi], axis=-1).reshape(-1).astype(jnp.int32)

    itemsize = jnp.dtype(src.dtype).itemsize
    vmem_bytes = int(
        2 * C * S_src * itemsize          # src block (double-buffered by the pipeline)
        + 2 * 3 * T * 4                   # flow tiles
        + 2 * C * T * max(itemsize, 4)    # output tiles
        + 8 * _SCHUNK * T * 4             # tent-weight temporaries + spill slack
        + (2 << 20))
    vmem_bytes = min(max(vmem_bytes, 8 << 20), 96 << 20)

    kernel = functools.partial(_warp_kernel, H=H, W=W, T=T, schunk=_SCHUNK)
    out = pl.pallas_call(
        kernel,
        out_shape=jax.ShapeDtypeStruct((N, C, S_out), src.dtype),
        grid_spec=pltpu.PrefetchScalarGridSpec(
            num_scalar_prefetch=3,
            grid=(N, n_tiles),
            in_specs=[
                pl.BlockSpec((None, 3, T), lambda n, t, *_: (n, 0, t)),       # flow
                pl.BlockSpec((None, C, S_src), lambda n, t, *_: (n, 0, 0)),   # src (resident across t)
            ],
            out_specs=pl.BlockSpec((None, C, T), lambda n, t, *_: (n, 0, t)),
        ),
        compiler_params=pltpu.CompilerParams(
            dimension_semantics=("parallel", "parallel"),
            vmem_limit_bytes=vmem_bytes),
    )(tile_base, chunk_base, bounds, flow_flat, src_flat)

    return out[:, :, :S].reshape(N, C, D, H, W)


def _reference(src, flow):
    """Pure-JAX reference matching the PyTorch forward (grid_sample, align_corners=True)."""
    N, C, D, H, W = src.shape
    sizes = (D, H, W)
    gd, gh, gw = jnp.meshgrid(
        jnp.arange(D, dtype=jnp.float32),
        jnp.arange(H, dtype=jnp.float32),
        jnp.arange(W, dtype=jnp.float32),
        indexing="ij")
    grid = jnp.stack([gd, gh, gw])[None]                          # (1, 3, D, H, W)
    new_locs = grid + flow                                        # (N, 3, D, H, W)
    # forward(): normalize to [-1, 1] ...
    norm = [2.0 * (new_locs[:, i] / (sizes[i] - 1) - 0.5) for i in range(3)]
    # ... grid_sample(align_corners=True): map back to voxel coordinates.
    pd, ph, pw = [(norm[i] + 1.0) * 0.5 * (sizes[i] - 1) for i in range(3)]

    d0f, h0f, w0f = jnp.floor(pd), jnp.floor(ph), jnp.floor(pw)
    fd, fh, fw = pd - d0f, ph - h0f, pw - w0f
    d0 = d0f.astype(jnp.int32)
    h0 = h0f.astype(jnp.int32)
    w0 = w0f.astype(jnp.int32)
    d1, h1, w1 = d0 + 1, h0 + 1, w0 + 1

    S = D * H * W
    src_flat = src.reshape(N, C, S).astype(jnp.float32)
    out = jnp.zeros((N, C, S), jnp.float32)
    for dc, wd in ((d0, 1.0 - fd), (d1, fd)):
        for hc, wh in ((h0, 1.0 - fh), (h1, fh)):
            for wc, ww in ((w0, 1.0 - fw), (w1, fw)):
                valid = ((dc >= 0) & (dc < D) & (hc >= 0) & (hc < H)
                         & (wc >= 0) & (wc < W))
                flat = (jnp.clip(dc, 0, D - 1) * (H * W)
                        + jnp.clip(hc, 0, H - 1) * W
                        + jnp.clip(wc, 0, W - 1)).reshape(N, 1, S)
                vals = jnp.take_along_axis(
                    src_flat, jnp.broadcast_to(flat, (N, C, S)), axis=2)
                wt = jnp.where(valid, wd * wh * ww, 0.0).reshape(N, 1, S)
                out = out + vals * wt
    return out.reshape(N, C, D, H, W).astype(src.dtype)


if __name__ == "__main__":
    key = jax.random.PRNGKey(0)
    ks, kf = jax.random.split(key)

    N, C, D, H, W = 2, 4, 8, 8, 8
    src = jax.random.normal(ks, (N, C, D, H, W), jnp.float32)
    # Displacements of a few voxels, including samples landing out of bounds
    # (exercises the zeros-padding path of grid_sample).
    flow = 3.0 * jax.random.normal(kf, (N, 3, D, H, W), jnp.float32)

    out = jax.block_until_ready(spatial_transformer_forward(src, flow))
    ref = jax.block_until_ready(_reference(src, flow))

    assert out.shape == (N, C, D, H, W), out.shape
    max_err = float(jnp.max(jnp.abs(out - ref)))
    assert jnp.allclose(out, ref, atol=1e-4, rtol=1e-4), max_err
    print("KERNEL_OK")
</pallas_src>

<mosaic_0001>
module attributes {stable_mosaic.version = 11 : i64} {
  func.func @_warp_kernel(%arg0: i32, %arg1: i32, %arg2: memref<4xi32, #tpu.memory_space<smem>>, %arg3: memref<8xi32, #tpu.memory_space<smem>>, %arg4: memref<8xi32, #tpu.memory_space<smem>>, %arg5: memref<1x3x256xf32, #tpu.memory_space<vmem>>, %arg6: memref<1x4x512xf32, #tpu.memory_space<vmem>>, %arg7: memref<1x4x256xf32, #tpu.memory_space<vmem>>) attributes {dimension_semantics = [#tpu.dimension_semantics<parallel>, #tpu.dimension_semantics<parallel>], iteration_bounds = array<i64: 2, 2>, scalar_prefetch = 3 : i64, scratch_operands = 0 : i64, tpu.core_type = #tpu.core_type<tc>, window_params = [{transform_indices = @transform_0, window_bounds = array<i64: 1, 3, 256>}, {transform_indices = @transform_1, window_bounds = array<i64: 1, 4, 512>}, {transform_indices = @transform_2, window_bounds = array<i64: 1, 4, 256>}]} {
    %c2_i32 = arith.constant 2 : i32
    %0 = arith.muli %c2_i32, %arg1 : i32
    %1 = arith.index_cast %0 : i32 to index
    %2 = memref.load %arg2[%1] : memref<4xi32, #tpu.memory_space<smem>>
    %3 = arith.sitofp %2 : i32 to f32
    %c2_i32_0 = arith.constant 2 : i32
    %4 = arith.muli %c2_i32_0, %arg1 : i32
    %c1_i32 = arith.constant 1 : i32
    %5 = arith.addi %4, %c1_i32 : i32
    %6 = arith.index_cast %5 : i32 to index
    %7 = memref.load %arg2[%6] : memref<4xi32, #tpu.memory_space<smem>>
    %8 = arith.sitofp %7 : i32 to f32
    %c2_i32_1 = arith.constant 2 : i32
    %9 = arith.muli %arg0, %c2_i32_1 : i32
    %10 = arith.addi %9, %arg1 : i32
    %c2_i32_2 = arith.constant 2 : i32
    %11 = arith.muli %c2_i32_2, %10 : i32
    %12 = arith.index_cast %11 : i32 to index
    %13 = memref.load %arg4[%12] : memref<8xi32, #tpu.memory_space<smem>>
    %c1_i32_3 = arith.constant 1 : i32
    %14 = arith.addi %11, %c1_i32_3 : i32
    %15 = arith.index_cast %14 : i32 to index
    %16 = memref.load %arg4[%15] : memref<8xi32, #tpu.memory_space<smem>>
    %17 = tpu.iota {dimensions = array<i32: 1>} : vector<1x256xi32>
    %18 = arith.sitofp %17 : vector<1x256xi32> to vector<1x256xf32>
    %19 = vector.broadcast %8 : f32 to vector<1x256xf32>
    %20 = arith.addf %19, %18 : vector<1x256xf32>
    %cst = arith.constant 5.000000e-01 : f32
    %21 = vector.broadcast %cst : f32 to vector<1x256xf32>
    %22 = arith.addf %20, %21 : vector<1x256xf32>
    %cst_4 = arith.constant 6.400000e+01 : f32
    %23 = vector.broadcast %cst_4 : f32 to vector<1x256xf32>
    %24 = arith.divf %22, %23 : vector<1x256xf32>
    %25 = math.floor %24 : vector<1x256xf32>
    %cst_5 = arith.constant 6.400000e+01 : f32
    %26 = vector.broadcast %cst_5 : f32 to vector<1x256xf32>
    %27 = arith.mulf %25, %26 : vector<1x256xf32>
    %28 = arith.subf %20, %27 : vector<1x256xf32>
    %cst_6 = arith.constant 5.000000e-01 : f32
    %29 = vector.broadcast %cst_6 : f32 to vector<1x256xf32>
    %30 = arith.addf %28, %29 : vector<1x256xf32>
    %cst_7 = arith.constant 8.000000e+00 : f32
    %31 = vector.broadcast %cst_7 : f32 to vector<1x256xf32>
    %32 = arith.divf %30, %31 : vector<1x256xf32>
    %33 = math.floor %32 : vector<1x256xf32>
    %cst_8 = arith.constant 8.000000e+00 : f32
    %34 = vector.broadcast %cst_8 : f32 to vector<1x256xf32>
    %35 = arith.mulf %33, %34 : vector<1x256xf32>
    %36 = arith.subf %28, %35 : vector<1x256xf32>
    %37 = vector.broadcast %3 : f32 to vector<1x256xf32>
    %38 = arith.addf %37, %25 : vector<1x256xf32>
    %c0 = arith.constant 0 : index
    %c0_9 = arith.constant 0 : index
    %c0_10 = arith.constant 0 : index
    %39 = vector.load %arg5[%c0, %c0_9, %c0_10] : memref<1x3x256xf32, #tpu.memory_space<vmem>>, vector<1x1x256xf32>
    %40 = vector.shape_cast %39 : vector<1x1x256xf32> to vector<1x256xf32>
    %41 = arith.addf %38, %40 : vector<1x256xf32>
    %c0_11 = arith.constant 0 : index
    %c1 = arith.constant 1 : index
    %c0_12 = arith.constant 0 : index
    %42 = vector.load %arg5[%c0_11, %c1, %c0_12] : memref<1x3x256xf32, #tpu.memory_space<vmem>>, vector<1x1x256xf32>
    %43 = vector.shape_cast %42 : vector<1x1x256xf32> to vector<1x256xf32>
    %44 = arith.addf %33, %43 : vector<1x256xf32>
    %c0_13 = arith.constant 0 : index
    %c2 = arith.constant 2 : index
    %c0_14 = arith.constant 0 : index
    %45 = vector.load %arg5[%c0_13, %c2, %c0_14] : memref<1x3x256xf32, #tpu.memory_space<vmem>>, vector<1x1x256xf32>
    %46 = vector.shape_cast %45 : vector<1x1x256xf32> to vector<1x256xf32>
    %47 = arith.addf %36, %46 : vector<1x256xf32>
    %cst_15 = arith.constant 0.000000e+00 : f32
    %48 = vector.broadcast %cst_15 : f32 to vector<4x256xf32>
    %c1_i32_16 = arith.constant 1 : i32
    %49 = arith.addi %16, %c1_i32_16 : i32
    %50 = arith.subi %49, %13 : i32
    %51 = arith.addi %13, %50 : i32
    %c1_i32_17 = arith.constant 1 : i32
    %52 = scf.for %arg8 = %13 to %51 step %c1_i32_17 iter_args(%arg9 = %48) -> (vector<4x256xf32>)  : i32 {
      %c128_i32 = arith.constant 128 : i32
      %56 = arith.muli %arg8, %c128_i32 : i32
      %57 = tpu.assume_multiple %56, 128 : i32
      %c0_21 = arith.constant 0 : index
      %c0_22 = arith.constant 0 : index
      %58 = arith.index_cast %57 : i32 to index
      %59 = vector.load %arg6[%c0_21, %c0_22, %58] : memref<1x4x512xf32, #tpu.memory_space<vmem>>, vector<1x4x128xf32>
      %60 = vector.shape_cast %59 : vector<1x4x128xf32> to vector<4x128xf32>
      %c2_i32_23 = arith.constant 2 : i32
      %61 = arith.muli %c2_i32_23, %arg8 : i32
      %62 = arith.index_cast %61 : i32 to index
      %63 = memref.load %arg3[%62] : memref<8xi32, #tpu.memory_space<smem>>
      %64 = arith.sitofp %63 : i32 to f32
      %c2_i32_24 = arith.constant 2 : i32
      %65 = arith.muli %c2_i32_24, %arg8 : i32
      %c1_i32_25 = arith.constant 1 : i32
      %66 = arith.addi %65, %c1_i32_25 : i32
      %67 = arith.index_cast %66 : i32 to index
      %68 = memref.load %arg3[%67] : memref<8xi32, #tpu.memory_space<smem>>
      %69 = arith.sitofp %68 : i32 to f32
      %70 = tpu.iota {dimensions = array<i32: 0>} : vector<128x1xi32>
      %71 = arith.sitofp %70 : vector<128x1xi32> to vector<128x1xf32>
      %72 = vector.broadcast %69 : f32 to vector<128x1xf32>
      %73 = arith.addf %72, %71 : vector<128x1xf32>
      %cst_26 = arith.constant 5.000000e-01 : f32
      %74 = vector.broadcast %cst_26 : f32 to vector<128x1xf32>
      %75 = arith.addf %73, %74 : vector<128x1xf32>
      %cst_27 = arith.constant 6.400000e+01 : f32
      %76 = vector.broadcast %cst_27 : f32 to vector<128x1xf32>
      %77 = arith.divf %75, %76 : vector<128x1xf32>
      %78 = math.floor %77 : vector<128x1xf32>
      %cst_28 = arith.constant 6.400000e+01 : f32
      %79 = vector.broadcast %cst_28 : f32 to vector<128x1xf32>
      %80 = arith.mulf %78, %79 : vector<128x1xf32>
      %81 = arith.subf %73, %80 : vector<128x1xf32>
      %cst_29 = arith.constant 5.000000e-01 : f32
      %82 = vector.broadcast %cst_29 : f32 to vector<128x1xf32>
      %83 = arith.addf %81, %82 : vector<128x1xf32>
      %cst_30 = arith.constant 8.000000e+00 : f32
      %84 = vector.broadcast %cst_30 : f32 to vector<128x1xf32>
      %85 = arith.divf %83, %84 : vector<128x1xf32>
      %86 = math.floor %85 : vector<128x1xf32>
      %cst_31 = arith.constant 8.000000e+00 : f32
      %87 = vector.broadcast %cst_31 : f32 to vector<128x1xf32>
      %88 = arith.mulf %86, %87 : vector<128x1xf32>
      %89 = arith.subf %81, %88 : vector<128x1xf32>
      %90 = vector.broadcast %64 : f32 to vector<128x1xf32>
      %91 = arith.addf %90, %78 : vector<128x1xf32>
      %92 = vector.broadcast %91 : vector<128x1xf32> to vector<128x256xf32>
      %93 = vector.broadcast %41 : vector<1x256xf32> to vector<128x256xf32>
      %94 = arith.subf %92, %93 : vector<128x256xf32>
      %95 = math.absf %94 : vector<128x256xf32>
      %cst_32 = arith.constant 1.000000e+00 : f32
      %96 = vector.broadcast %cst_32 : f32 to vector<128x256xf32>
      %97 = arith.subf %96, %95 : vector<128x256xf32>
      %cst_33 = arith.constant 0.000000e+00 : f32
      %98 = vector.broadcast %cst_33 : f32 to vector<128x256xf32>
      %99 = arith.maximumf %97, %98 : vector<128x256xf32>
      %100 = vector.broadcast %86 : vector<128x1xf32> to vector<128x256xf32>
      %101 = vector.broadcast %44 : vector<1x256xf32> to vector<128x256xf32>
      %102 = arith.subf %100, %101 : vector<128x256xf32>
      %103 = math.absf %102 : vector<128x256xf32>
      %cst_34 = arith.constant 1.000000e+00 : f32
      %104 = vector.broadcast %cst_34 : f32 to vector<128x256xf32>
      %105 = arith.subf %104, %103 : vector<128x256xf32>
      %cst_35 = arith.constant 0.000000e+00 : f32
      %106 = vector.broadcast %cst_35 : f32 to vector<128x256xf32>
      %107 = arith.maximumf %105, %106 : vector<128x256xf32>
      %108 = arith.mulf %99, %107 : vector<128x256xf32>
      %109 = vector.broadcast %89 : vector<128x1xf32> to vector<128x256xf32>
      %110 = vector.broadcast %47 : vector<1x256xf32> to vector<128x256xf32>
      %111 = arith.subf %109, %110 : vector<128x256xf32>
      %112 = math.absf %111 : vector<128x256xf32>
      %cst_36 = arith.constant 1.000000e+00 : f32
      %113 = vector.broadcast %cst_36 : f32 to vector<128x256xf32>
      %114 = arith.subf %113, %112 : vector<128x256xf32>
      %cst_37 = arith.constant 0.000000e+00 : f32
      %115 = vector.broadcast %cst_37 : f32 to vector<128x256xf32>
      %116 = arith.maximumf %114, %115 : vector<128x256xf32>
      %117 = arith.mulf %108, %116 : vector<128x256xf32>
      %cst_38 = arith.constant dense<0.000000e+00> : vector<4x256xf32>
      %118 = tpu.matmul %60, %117, %cst_38 {dimension_numbers = #tpu.dot_dimension_numbers<[1], [0], [0], [1], [0, 0, 1, 1], [], []>} : vector<4x128xf32>, vector<128x256xf32>, vector<4x256xf32> -> vector<4x256xf32>
      %119 = arith.addf %arg9, %118 : vector<4x256xf32>
      scf.yield %119 : vector<4x256xf32>
    }
    %c0_18 = arith.constant 0 : index
    %c0_19 = arith.constant 0 : index
    %c0_20 = arith.constant 0 : index
    %53 = vector.load %arg7[%c0_18, %c0_19, %c0_20] : memref<1x4x256xf32, #tpu.memory_space<vmem>>, vector<1x4x256xf32>
    %54 = vector.shape_cast %53 : vector<1x4x256xf32> to vector<4x256xf32>
    %55 = vector.shape_cast %52 : vector<4x256xf32> to vector<1x4x256xf32>
    tpu.vector_store %arg7[%c0_18, %c0_19, %c0_20], %55 {strides = array<i32>} : memref<1x4x256xf32, #tpu.memory_space<vmem>>, vector<1x4x256xf32>,
    return
  }
  func.func @transform_0(%arg0: i32, %arg1: i32, %arg2: memref<4xi32, #tpu.memory_space<smem>>, %arg3: memref<8xi32, #tpu.memory_space<smem>>, %arg4: memref<8xi32, #tpu.memory_space<smem>>) -> (i32, i32, i32) {
    %c0_i32 = arith.constant 0 : i32
    %c0_i32_0 = arith.constant 0 : i32
    return %arg0, %c0_i32, %arg1 : i32, i32, i32
  }
  func.func @transform_1(%arg0: i32, %arg1: i32, %arg2: memref<4xi32, #tpu.memory_space<smem>>, %arg3: memref<8xi32, #tpu.memory_space<smem>>, %arg4: memref<8xi32, #tpu.memory_space<smem>>) -> (i32, i32, i32) {
    %c0_i32 = arith.constant 0 : i32
    %c0_i32_0 = arith.constant 0 : i32
    %c0_i32_1 = arith.constant 0 : i32
    return %arg0, %c0_i32, %c0_i32_0 : i32, i32, i32
  }
  func.func @transform_2(%arg0: i32, %arg1: i32, %arg2: memref<4xi32, #tpu.memory_space<smem>>, %arg3: memref<8xi32, #tpu.memory_space<smem>>, %arg4: memref<8xi32, #tpu.memory_space<smem>>) -> (i32, i32, i32) {
    %c0_i32 = arith.constant 0 : i32
    %c0_i32_0 = arith.constant 0 : i32
    return %arg0, %c0_i32, %arg1 : i32, i32, i32
  }
}

</mosaic_0001>

<bundles_post_ra>
// kernel: tpu_custom_call.1
= control target key start
LH: loop header
LB: loop body
LE: loop exit
PB: predicated region body
PF: predicated region fallthrough
CT: control target
= control target key end

     0   :  { %s2176_s0 = inlined_call_operand.vmem [shape: s32[4], index: 0, kind: input, shape index: {}]   ;;  %s2177_s3 = inlined_call_operand.vmem [shape: f32[2,3,512], index: 3, kind: input, shape index: {}]   ;;  %s2178_s4 = inlined_call_operand.vmem [shape: f32[2,4,512], index: 4, kind: input, shape index: {}]   ;;  %s2179_s5 = inlined_call_operand.hbm [shape: f32[2,4,512], index: 5, kind: output, shape index: {}]   ;;  %s2180_s1 = inlined_call_operand.vmem [shape: s32[8], index: 1, kind: input, shape index: {}]   ;;  %s2181_s2 = inlined_call_operand.vmem [shape: s32[8], index: 2, kind: input, shape index: {}]  }
   0x1   :  { %s10_s20 = sshll.u32 %s2176_s0, 4  ;;  %s14_s23 = sshll.u32 %s2180_s1, 4  ;;  %s11_s20 = int_to_ptr.vmem [resolvable:$true] %s10_s20  ;;  %s15_s23 = int_to_ptr.vmem [resolvable:$true] %s14_s23 }
   0x2   :  { %s1391_s24 = scalar_lea.vmem %s11_s20, 16  ;;  %p1396_p1 = scmp.lt.s32.totalorder %s11_s20, %s11_s20 }
   0x3   :  { %p1392_p0 = scmp.ne.s32.totalorder %s11_s20, %s1391_s24  ;;  %p1397_p2 = scmp.lt.s32.totalorder %s1391_s24, %s1391_s24 }
   0x5   :  { %p1398_p3 = por %p1397_p2, %p1396_p1 }
   0x7   :  { %p1399_p4 = pnand %p1398_p3, %p1392_p0 }
   0x9   :  { %1402 = shalt.err (!%p1399_p4)  }
   0xa   :  { %s1565_s25 = smov [#allocation3]   ;;  %s1403_s26 = scalar_lea.vmem %s15_s23, 16 }
   0xb   :  { %13 = dma.vmem_to_smem %s11_s20, 16, %s1565_s25, [#allocation2] }
   0xc   :  { %p1404_p5 = scmp.ne.s32.totalorder %s15_s23, %s1403_s26  ;;  %p1408_p6 = scmp.lt.s32.totalorder %s15_s23, %s15_s23 }
   0xd   :  { %p1409_p7 = scmp.lt.s32.totalorder %s1403_s26, %s1403_s26 }
   0xf   :  { %p1410_p8 = por %p1409_p7, %p1408_p6 }
  0x11   :  { %p1411_p9 = pnand %p1410_p8, %p1404_p5 }
  0x13   :  { %1414 = shalt.err (!%p1411_p9)  }
  0x14   :  { %s1566_s0 = smov [#allocation4]   ;;  %s18_s28 = sshll.u32 %s2181_s2, 4  ;;  %s19_s28 = int_to_ptr.vmem [resolvable:$true] %s18_s28 }
  0x15   :  { %17 = dma.vmem_to_smem %s15_s23, 16, %s1566_s0, [#allocation2] }
  0x16   :  { %s1415_s29 = scalar_lea.vmem %s19_s28, 16  ;;  %p1420_p11 = scmp.lt.s32.totalorder %s19_s28, %s19_s28 }
  0x17   :  { %p1416_p10 = scmp.ne.s32.totalorder %s19_s28, %s1415_s29  ;;  %p1421_p12 = scmp.lt.s32.totalorder %s1415_s29, %s1415_s29 }
  0x19   :  { %p1422_p13 = por %p1421_p12, %p1420_p11 }
  0x1b   :  { %p1423_p0 = pnand %p1422_p13, %p1416_p10 }
  0x1d   :  { %1426 = shalt.err (!%p1423_p0)  }
  0x1e   :  { %s1567_s30 = smov [#allocation5]  }
  0x1f   :  { %21 = dma.vmem_to_smem %s19_s28, 16, %s1567_s30, [#allocation2] }
  0x20   :  { %1507 = dma.done.wait [#allocation2], 48 }
  0x21   :  { %1508 = vsyncadd [#allocation2], 4294967248 }
  0x22   :  { %23 = sfence }
  0x23   :  { %24 = vsyncpa [#allocation7], 0 }
  0x24   :  { %26 = vsyncpa [#allocation7 + $0x1], 0  ;;  %s1609_s6 = smov 0   ;;  %s1611_s7 = smov 0  }
  0x25   :  { %s1613_s2 = smov 0   ;;  %s1615_s8 = smov 0  }
  0x26   :  { %s1617_s9 = smov 0   ;;  %s1619_s10 = smov 0  }
  0x27   :  { %s1621_s11 = smov 0   ;;  %s1623_s12 = smov 0  }
  0x28 LB: > { %2191 = sst [smem:[#allocation10_spill]] %s1535_s10  ;;  %s1218_s13 = sadd.s32 4294967295, %s1543_s12   ;;  %s1543_s12 = sphi %s1623_s12, %s32_s12   ;;  %s1539_s11 = sphi %s1621_s11, %s2235_s11   ;;  %s1535_s10 = sphi %s1619_s10, %s2234_s10   ;;  %s1531_s9 = sphi %s1617_s9, %s2233_s9   ;;  %s1527_s8 = sphi %s1615_s8, %s2232_s8   ;;  %s1523_s2 = sphi %s1613_s2, %s2238_s2   ;;  %s1519_s7 = sphi %s1611_s7, %s2237_s7   ;;  %s1515_s6 = sphi %s1609_s6, %s2236_s6  }
  0x29   : > { %2192 = sst [smem:[#allocation11_spill]] %s1539_s11  ;;  %s1219_s14 = sadd.s32 4294967294, %s1543_s12  }
  0x2a   : > { %s41_s15 = sadd.s32 1, %s1535_s10  ;;  %s44_s16 = sadd.s32 1, %s1539_s11 }
  0x2b   : > { %p42_p1 = scmp.ge.s32.totalorder %s41_s15, 2  ;;  %p117_p2 = scmp.ne.s32.totalorder %s1523_s2, %s1519_s7 }
  0x2c   : > { %p118_p3 = scmp.eq.s32.totalorder %s1218_s13, 3  ;;  %p123_p6 = scmp.ne.s32.totalorder %s1519_s7, %s1515_s6 }
  0x2d   : > { %s2240_s15 = smov (%p42_p1, %s41_s15), 0  ;;  %s2242_s16 = smov (!%p42_p1, %s44_s16), %s1539_s11 }
  0x2e   : > { %2193 = sst [smem:[#allocation12_spill]] %s2240_s15  ;;  %s103_s17 = ssub.s32 %s1535_s10, %s2240_s15 }
  0x2f   : > { %p1660_p4 = por %p118_p3, %p117_p2  ;;  %p46_p5 = scmp.ge.s32.totalorder %s2242_s16, 2 }
  0x30   : > { %p124_p7 = scmp.eq.s32.totalorder %s1219_s14, 3  ;;  %p1222_p8 = scmp.ge.s32.totalorder %s1543_s12, 1 }
  0x31   : > { %s2244_s16 = smov (%p46_p5, %s2242_s16), 0  ;;  %p163_p10 = scmp.lt.s32.totalorder %s1543_s12, 5 }
  0x32   : > { %2195 = sst [smem:[#allocation13_spill]] %s2244_s16  ;;  %p1669_p9 = por %p124_p7, %p123_p6 }
  0x33   : > { %s102_s20 = ssub.s32 %s1539_s11, %s2244_s16  ;;  %s107_s21 = sadd.s32 1, %s1523_s2 }
  0x34   : > { %s104_s22 = sor.u32 %s103_s17, %s102_s20  ;;  %p164_p11 = pnand %p1222_p8, %p163_p10 }
  0x35   : > { %p105_p12 = scmp.eq.s32.totalorder %s104_s22, 0 }
  0x36   : > { %167 = sbr.rel (%p164_p11) target bundleno = 532 (0x214), region = 28 }
  0x37   : > { %s1678_s23 = scalar_select %p105_p12, %s1523_s2, %s107_s21  }
  0x3d   : > { %s2182_s24 = sand.u32 1, %s1519_s7   ;;  %s1682_s25 = sshll.u32 %s1527_s8, 1  ;;  %v222_v0 = vlaneseq  ;;  %v1739_v49 = vmov 0.0   ;;  %v1741_v50 = vmov 0.0  }
  0x3e   : > { %s1686_s26 = sshll.u32 %s2182_s24, 3  ;;  %p195_p13 = scmp.lt.s32.totalorder %s1531_s9, 1 }
  0x3f   : > { %p197_p0 = scmp.lt.s32.totalorder %s1682_s25, 3  ;;  %v223_v1 = vand.u32 127, %v222_v0  ;;  %s213_s14 = sadd.s32 1, %s1682_s25  ;;  %v1705_v5 = vshrl.u32 %v222_v0, 7 }
  0x40   : > { %s196_s0 = scalar_select %p195_p13, %s1531_s9, 1 }
  0x41   : > { %s198_s1 = scalar_select %p197_p0, %s1682_s25, 3  ;;  %v224_v2 = vadd.s32 128, %v223_v1  ;;  %v225_v3 = vcvt.s32.f32 %v223_v1  ;;  %2197 = vst [vmem:[#allocation14_spill] sm:$0xff] %v1705_v5  ;;  %v1714_v11 = vsub.s32 0, %v1705_v5  ;;  %v263_v12 = vsub.s32 1, %v1705_v5 }
  0x42   : > { %s1243_s27 = sshll.u32 %s196_s0, 4  ;;  %s1225_s13 = sshll.u32 %s196_s0, 2 }
  0x43   : > { %s1695_s30 = scalar_lea.vmem %s2178_s4, %s1243_s27  ;;  %s214_s17 = sld [smem:[#allocation3 + %s213_s14]]  ;;  %v226_v4 = vcvt.s32.f32 %v224_v2  ;;  %2198 = vst [vmem:[#allocation15_spill] sm:$0xff] %v1714_v11 }
  0x44   : > { %s1230_s20 = sshll.u32 %s1531_s9, 1  ;;  %s200_s21 = sadd.s32 %s1225_s13, %s198_s1 }
  0x45   : > { %s217_s22 = sadd.s32 %s1527_s8, %s1230_s20  ;;  %s211_s24 = sld [smem:[#allocation3 + %s1682_s25]] }
  0x46   : > { %s1231_s16 = sshll.u32 %s217_s22, 1  ;;  %s1226_s27 = sshll.u32 %s200_s21, 2 }
  0x47   : > { %s1701_s15 = sld [smem:[#allocation5 + %s1231_s16]]   ;;  %s220_s11 = sadd.s32 1, %s1231_s16 }
  0x48   : > { %s1703_s10 = sld [smem:[#allocation5 + %s220_s11]]  ;;  %s1710_s8 = scalar_lea.vmem %s2177_s3, %s1226_s27 }
  0x49   : > { %s215_s28 = scvt.s32.f32 %s214_s17  ;;  %v255_v13 = vld [vmem:[%s1710_s8] ss:$4 sm:$0x3]  ;;  %v1232_v29 = vld [vmem:[%s1710_s8 + $0x1] ss:$4 sm:$0x3] }
  0x4a   : > { %v260_v19 = vrot.slane %v255_v13, %v1714_v11  ;;  %v264_v20 = vrot.slane %v255_v13, %v263_v12  ;;  %v275_v34 = vrot.slane %v1232_v29, %v1714_v11  ;;  %v279_v35 = vrot.slane %v1232_v29, %v263_v12  ;;  %v1233_v36 = vld [vmem:[%s1710_s8 + $0x2] ss:$4 sm:$0x3]  ;;  %s193_s11 = scalar_lea.vmem [#allocation6], %s1686_s26 }
  0x4b   : > { %v227_v6 = vstv %s215_s28  ;;  %s212_s1 = scvt.s32.f32 %s211_s24  ;;  %v290_v39 = vrot.slane %v1233_v36, %v1714_v11  ;;  %v294_v40 = vrot.slane %v1233_v36, %v263_v12 }
  0x4c   : > { %v228_v7 = vadd.f32 %v227_v6, %v225_v3  ;;  %v229_v8 = vadd.f32 %v227_v6, %v226_v4 }
  0x4d   : > { %v252_v16 = vstv %s212_s1 }
  0x4e   : > { %s299_s16 = sadd.s32 1, %s1703_s10  ;;  %v230_v9 = vadd.f32 0.5, %v228_v7  ;;  %v231_v10 = vadd.f32 0.5, %v229_v8 }
  0x4f   : > { %p1170_p1 = scmp.ge.s32.totalorder %s1701_s15, %s299_s16 }
  0x50   : > { %v233_v14 = vmul.f32 0.015625, %v230_v9  ;;  %v234_v15 = vmul.f32 0.015625, %v231_v10  ;;  %v1743_v51 = vmov (!%p1170_p1), 0.0   ;;  %v1745_v52 = vmov (!%p1170_p1), 0.0  }
  0x52   : > { %v235_v17 = vfloor.f32 %v233_v14  ;;  %v236_v18 = vfloor.f32 %v234_v15 }
  0x54   : > { %v237_v21 = vmul.f32 64.0, %v235_v17  ;;  %v238_v22 = vmul.f32 64.0, %v236_v18  ;;  %v253_v23 = vadd.f32 %v252_v16, %v235_v17  ;;  %v254_v24 = vadd.f32 %v252_v16, %v236_v18 }
  0x56   : > { %v239_v25 = vsub.f32 %v228_v7, %v237_v21  ;;  %v240_v26 = vsub.f32 %v229_v8, %v238_v22  ;;  %v1719_v27 = vadd.f32 %v260_v19, %v253_v23  ;;  %v1721_v28 = vadd.f32 %v264_v20, %v254_v24 }
  0x58   : > { %2199 = vst [vmem:[#allocation16_spill] sm:$0xff] %v1719_v27  ;;  %2200 = vst [vmem:[#allocation17_spill] sm:$0xff] %v1721_v28  ;;  %v241_v30 = vadd.f32 0.5, %v239_v25  ;;  %v242_v31 = vadd.f32 0.5, %v240_v26 }
  0x5a   : > { %v244_v32 = vmul.f32 0.125, %v241_v30  ;;  %v245_v33 = vmul.f32 0.125, %v242_v31 }
  0x5c   : > { %v246_v37 = vfloor.f32 %v244_v32  ;;  %v247_v38 = vfloor.f32 %v245_v33 }
  0x5e   : > { %v248_v41 = vmul.f32 8.0, %v246_v37  ;;  %v249_v42 = vmul.f32 8.0, %v247_v38  ;;  %v1727_v43 = vadd.f32 %v275_v34, %v246_v37  ;;  %v1729_v44 = vadd.f32 %v279_v35, %v247_v38  ;;  %1173 = sbr.rel (%p1170_p1) target bundleno = 506 (0x1fa), region = 70 }
  0x60   : > { %2201 = vst [vmem:[#allocation18_spill] sm:$0xff] %v1727_v43  ;;  %2202 = vst [vmem:[#allocation19_spill] sm:$0xff] %v1729_v44  ;;  %v250_v45 = vsub.f32 %v239_v25, %v248_v41  ;;  %v251_v46 = vsub.f32 %v240_v26, %v249_v42 }
  0x62   : > { %v1731_v47 = vadd.f32 %v290_v39, %v250_v45  ;;  %v1733_v48 = vadd.f32 %v294_v40, %v251_v46 }
  0x64   : > { %2203 = vst [vmem:[#allocation20_spill] sm:$0xff] %v1731_v47 }
  0x65 LB: >> { %v2204_v11 = vld [vmem:[#allocation15_spill] sm:$0xff]  ;;  %v2205_v5 = vld [vmem:[#allocation14_spill] sm:$0xff]  ;;  %s1236_s24 = sshll.u32 %s1555_s15, 1  ;;  %v2206_v28 = vld [vmem:[#allocation17_spill] sm:$0xff]  ;;  %s1234_s22 = sshll.u32 %s1555_s15, 7  ;;  %v1551_v52 = vphi %v1745_v52, %v2228_v52   ;;  %v1547_v51 = vphi %v1743_v51, %v2227_v51   ;;  %s1555_s15 = sphi %s1701_s15, %s303_s15  }
  0x66   : >> { %s1760_s13 = sld [smem:[#allocation4 + %s1236_s24]]  ;;  %s317_s14 = sadd.s32 1, %s1236_s24  ;;  %v322_v53 = vadd.s32 8, %v2205_v5  ;;  %v337_v54 = vcvt.s32.f32 %v2205_v5  ;;  %v1766_v55 = vrot.slane %v2206_v28, %v2204_v11  ;;  %v1776_v57 = vrot.slane %v1733_v48, %v2204_v11  ;;  %v2208_v27 = vld [vmem:[#allocation16_spill] sm:$0xff] }
  0x67   : >> { %s1768_s17 = sld [smem:[#allocation4 + %s317_s14]]  ;;  %v2207_v44 = vld [vmem:[#allocation19_spill] sm:$0xff]  ;;  %v1780_v58 = vrot.slane %v2208_v27, %v2204_v11  ;;  %v2209_v43 = vld [vmem:[#allocation18_spill] sm:$0xff]  ;;  %v323_v60 = vadd.s32 16, %v2205_v5  ;;  %v324_v61 = vadd.s32 24, %v2205_v5  ;;  %v325_v62 = vadd.s32 32, %v2205_v5 }
  0x68   : >> { %v1772_v56 = vrot.slane %v2207_v44, %v2204_v11  ;;  %v1784_v59 = vrot.slane %v2209_v43, %v2204_v11  ;;  %v326_v63 = vadd.s32 40, %v2205_v5  ;;  %v327_v0 = vadd.s32 48, %v2205_v5  ;;  %s309_s27 = sshra.s32 %s1234_s22, 7  ;;  %s303_s15 = sadd.s32 1, %s1555_s15  }
  0x69   : >> { %v328_v1 = vadd.s32 56, %v2205_v5  ;;  %v1793_v2 = vadd.s32 64, %v2205_v5  ;;  %v1796_v3 = vadd.s32 72, %v2205_v5  ;;  %v1799_v4 = vadd.s32 80, %v2205_v5  ;;  %s1235_s28 = sshll.u32 %s309_s27, 2  ;;  %p302_p2 = scmp.ge.s32.totalorder %s303_s15, %s299_s16 }
  0x6a   : >> { %v1802_v6 = vadd.s32 88, %v2205_v5  ;;  %v1805_v7 = vadd.s32 96, %v2205_v5  ;;  %v1808_v8 = vadd.s32 104, %v2205_v5  ;;  %v338_v9 = vcvt.s32.f32 %v322_v53  ;;  %s312_s0 = scalar_lea.vmem %s1695_s30, %s1235_s28 }
  0x6b   : >> { %v2210_v47 = vld [vmem:[#allocation20_spill] sm:$0xff]  ;;  %v1815_v12 = vadd.s32 112, %v2205_v5  ;;  %v1818_v13 = vadd.s32 120, %v2205_v5  ;;  %v339_v14 = vcvt.s32.f32 %v323_v60  ;;  %v340_v15 = vcvt.s32.f32 %v324_v61 }
  0x6c   : >> { %v1812_v10 = vrot.slane %v2210_v47, %v2204_v11  ;;  %s316_s20 = scvt.s32.f32 %s1760_s13  ;;  %v341_v16 = vcvt.s32.f32 %v325_v62  ;;  %v342_v17 = vcvt.s32.f32 %v326_v63  ;;  %v343_v18 = vcvt.s32.f32 %v327_v0 }
  0x6d   : >> { %s319_s21 = scvt.s32.f32 %s1768_s17  ;;  %v344_v19 = vcvt.s32.f32 %v328_v1 }
  0x6e   : >> { %v1830_v29 = vstv %s316_s20 }
  0x6f   : >> { %v1828_v26 = vstv %s319_s21 }
  0x70   : >> { %v354_v32 = vadd.f32 %v1828_v26, %v337_v54  ;;  %v355_v33 = vadd.f32 %v1828_v26, %v338_v9  ;;  %v356_v34 = vadd.f32 %v1828_v26, %v339_v14  ;;  %v357_v35 = vadd.f32 %v1828_v26, %v340_v15 }
  0x71   : >> { %v1839_v36 = vadd.f32 %v1828_v26, %v341_v16  ;;  %v1842_v37 = vadd.f32 %v1828_v26, %v342_v17  ;;  %v1845_v38 = vadd.f32 %v1828_v26, %v343_v18  ;;  %v1848_v39 = vadd.f32 %v1828_v26, %v344_v19 }
  0x72   : >> { %v370_v40 = vadd.f32 0.5, %v354_v32  ;;  %v371_v41 = vadd.f32 0.5, %v355_v33  ;;  %v372_v42 = vadd.f32 0.5, %v356_v34  ;;  %v373_v45 = vadd.f32 0.5, %v357_v35 }
  0x73   : >> { %v374_v46 = vadd.f32 0.5, %v1839_v36  ;;  %v375_v49 = vadd.f32 0.5, %v1842_v37  ;;  %v376_v50 = vadd.f32 0.5, %v1845_v38  ;;  %v377_v53 = vadd.f32 0.5, %v1848_v39 }
  0x74   : >> { %v386_v54 = vmul.f32 0.015625, %v370_v40  ;;  %v387_v60 = vmul.f32 0.015625, %v371_v41  ;;  %v388_v61 = vmul.f32 0.015625, %v372_v42  ;;  %v389_v62 = vmul.f32 0.015625, %v373_v45 }
  0x75   : >> { %v1854_v63 = vmul.f32 0.015625, %v374_v46  ;;  %v1856_v0 = vmul.f32 0.015625, %v375_v49  ;;  %v1858_v1 = vmul.f32 0.015625, %v376_v50  ;;  %v1860_v9 = vmul.f32 0.015625, %v377_v53 }
  0x76   : >> { %v402_v14 = vfloor.f32 %v386_v54  ;;  %v403_v15 = vfloor.f32 %v387_v60  ;;  %v404_v16 = vfloor.f32 %v388_v61  ;;  %v405_v17 = vfloor.f32 %v389_v62 }
  0x78   : >> { %v418_v42 = vmul.f32 64.0, %v402_v14  ;;  %v419_v45 = vmul.f32 64.0, %v403_v15  ;;  %v531_v46 = vadd.f32 %v1830_v29, %v402_v14  ;;  %v532_v49 = vadd.f32 %v1830_v29, %v403_v15 }
  0x79   : >> { %v420_v50 = vmul.f32 64.0, %v404_v16  ;;  %v421_v53 = vmul.f32 64.0, %v405_v17  ;;  %v1869_v54 = vadd.f32 %v1830_v29, %v404_v16  ;;  %v1872_v60 = vadd.f32 %v1830_v29, %v405_v17 }
  0x7a   : >> { %v434_v61 = vsub.f32 %v354_v32, %v418_v42  ;;  %v435_v62 = vsub.f32 %v355_v33, %v419_v45  ;;  %v556_v31 = vsub.f32 %v531_v46, %v1766_v55  ;;  %v558_v30 = vsub.f32 %v532_v49, %v1766_v55 }
  0x7b   : >> { %v555_v25 = vsub.f32 %v531_v46, %v1780_v58  ;;  %v557_v14 = vsub.f32 %v532_v49, %v1780_v58  ;;  %v436_v24 = vsub.f32 %v356_v34, %v420_v50  ;;  %v437_v15 = vsub.f32 %v357_v35, %v421_v53 }
  0x7c   : >> { %v450_v23 = vadd.f32 0.5, %v434_v61  ;;  %v451_v22 = vadd.f32 0.5, %v435_v62  ;;  %v588_v21 = vand.u32 2147483647, %v556_v31  ;;  %v590_v16 = vand.u32 2147483647, %v558_v30 }
  0x7d   : >> { %v587_v20 = vand.u32 2147483647, %v555_v25  ;;  %v589_v41 = vand.u32 2147483647, %v557_v14  ;;  %v452_v17 = vadd.f32 0.5, %v436_v24  ;;  %v453_v40 = vadd.f32 0.5, %v437_v15 }
  0x7e   : >> { %v466_v32 = vmul.f32 0.125, %v450_v23  ;;  %v467_v33 = vmul.f32 0.125, %v451_v22  ;;  %v620_v42 = vsub.f32 1.0, %v588_v21  ;;  %v622_v45 = vsub.f32 1.0, %v590_v16 }
  0x7f   : >> { %v619_v19 = vsub.f32 1.0, %v587_v20  ;;  %v621_v18 = vsub.f32 1.0, %v589_v41  ;;  %v468_v5 = vmul.f32 0.125, %v452_v17  ;;  %v469_v46 = vmul.f32 0.125, %v453_v40 }
  0x80   : >> { %v482_v11 = vfloor.f32 %v466_v32  ;;  %v483_v49 = vfloor.f32 %v467_v33  ;;  %v652_v34 = vmax.f32 %v620_v42, 0.0  ;;  %v654_v35 = vmax.f32 %v622_v45, 0.0 }
  0x81   : >> { %v651_v50 = vmax.f32 %v619_v19, 0.0  ;;  %v653_v53 = vmax.f32 %v621_v18, 0.0  ;;  %v1878_v31 = vfloor.f32 %v468_v5  ;;  %v1880_v25 = vfloor.f32 %v469_v46 }
  0x82   : >> { %v498_v30 = vmul.f32 8.0, %v482_v11  ;;  %v499_v14 = vmul.f32 8.0, %v483_v49  ;;  %v692_v22 = vsub.f32 %v482_v11, %v1772_v56  ;;  %v694_v21 = vsub.f32 %v483_v49, %v1772_v56 }
  0x83   : >> { %v691_v20 = vsub.f32 %v482_v11, %v1784_v59  ;;  %v693_v23 = vsub.f32 %v483_v49, %v1784_v59  ;;  %v500_v40 = vmul.f32 8.0, %v1878_v31  ;;  %v501_v41 = vmul.f32 8.0, %v1880_v25 }
  0x84   : >> { %v514_v19 = vsub.f32 %v434_v61, %v498_v30  ;;  %v515_v18 = vsub.f32 %v435_v62, %v499_v14  ;;  %v724_v5 = vand.u32 2147483647, %v692_v22  ;;  %v726_v16 = vand.u32 2147483647, %v694_v21 }
  0x85   : >> { %v723_v17 = vand.u32 2147483647, %v691_v20  ;;  %v725_v32 = vand.u32 2147483647, %v693_v23  ;;  %v1888_v33 = vsub.f32 %v436_v24, %v500_v40  ;;  %v1890_v42 = vsub.f32 %v437_v15, %v501_v41 }
  0x86   : >> { %v756_v45 = vsub.f32 1.0, %v724_v5  ;;  %v758_v46 = vsub.f32 1.0, %v726_v16  ;;  %v860_v11 = vsub.f32 %v514_v19, %v1776_v57  ;;  %v862_v49 = vsub.f32 %v515_v18, %v1776_v57 }
  0x87   : >> { %v755_v27 = vsub.f32 1.0, %v723_v17  ;;  %v757_v28 = vsub.f32 1.0, %v725_v32  ;;  %v859_v43 = vsub.f32 %v514_v19, %v1812_v10  ;;  %v861_v61 = vsub.f32 %v515_v18, %v1812_v10 }
  0x88   : >> { %v788_v62 = vmax.f32 %v756_v45, 0.0  ;;  %v790_v30 = vmax.f32 %v758_v46, 0.0  ;;  %v892_v14 = vand.u32 2147483647, %v860_v11  ;;  %v894_v22 = vand.u32 2147483647, %v862_v49 }
  0x89   : >> { %v787_v24 = vmax.f32 %v755_v27, 0.0  ;;  %v789_v21 = vmax.f32 %v757_v28, 0.0  ;;  %v891_v15 = vand.u32 2147483647, %v859_v43  ;;  %v893_v20 = vand.u32 2147483647, %v861_v61 }
  0x8a   : >> { %v820_v23 = vmul.f32 %v788_v62, %v652_v34  ;;  %v822_v40 = vmul.f32 %v790_v30, %v654_v35  ;;  %v924_v41 = vsub.f32 1.0, %v892_v14  ;;  %v926_v5 = vsub.f32 1.0, %v894_v22 }
  0x8b   : >> { %v819_v16 = vmul.f32 %v787_v24, %v651_v50  ;;  %v821_v44 = vmul.f32 %v789_v21, %v653_v53  ;;  %v923_v17 = vsub.f32 1.0, %v891_v15  ;;  %v925_v32 = vsub.f32 1.0, %v893_v20 }
  0x8c   : >> { %v956_v47 = vmax.f32 %v924_v41, 0.0  ;;  %v958_v19 = vmax.f32 %v926_v5, 0.0  ;;  %v560_v18 = vsub.f32 %v1869_v54, %v1766_v55  ;;  %v562_v45 = vsub.f32 %v1872_v60, %v1766_v55 }
  0x8d   : >> { %v955_v27 = vmax.f32 %v923_v17, 0.0  ;;  %v957_v28 = vmax.f32 %v925_v32, 0.0  ;;  %v696_v43 = vsub.f32 %v1878_v31, %v1772_v56  ;;  %v698_v34 = vsub.f32 %v1880_v25, %v1772_v56 }
  0x8e   : >> { %v988_v35 = vmul.f32 %v956_v47, %v820_v23  ;;  %v990_v50 = vmul.f32 %v958_v19, %v822_v40  ;;  %v592_v53 = vand.u32 2147483647, %v560_v18  ;;  %v594_v46 = vand.u32 2147483647, %v562_v45 }
  0x8f   : >> { %v987_v11 = vmul.f32 %v955_v27, %v819_v16  ;;  %v989_v49 = vmul.f32 %v957_v28, %v821_v44  ;;  %v728_v61 = vand.u32 2147483647, %v696_v43  ;;  %v730_v62 = vand.u32 2147483647, %v698_v34 }
  0x90   : >> { %v1244_v30 = vpack.c.bf16 %v990_v50, %v988_v35  ;;  %v624_v14 = vsub.f32 1.0, %v592_v53  ;;  %v626_v22 = vsub.f32 1.0, %v594_v46  ;;  %v864_v24 = vsub.f32 %v1888_v33, %v1776_v57 }
  0x91   : >> { %v1246_v21 = vpack.c.bf16 %v989_v49, %v987_v11  ;;  %v760_v15 = vsub.f32 1.0, %v728_v61  ;;  %v762_v20 = vsub.f32 1.0, %v730_v62  ;;  %v866_v41 = vsub.f32 %v1890_v42, %v1776_v57 }
  0x92   : >> { %1245 = vmatprep.subr.bf16.mxu0 %v1244_v30  ;;  %v656_v47 = vmax.f32 %v624_v14, 0.0  ;;  %v658_v23 = vmax.f32 %v626_v22, 0.0  ;;  %v896_v40 = vand.u32 2147483647, %v864_v24  ;;  %v559_v44 = vsub.f32 %v1869_v54, %v1780_v58 }
  0x93   : >> { %1247 = vmatpush1.bf16.msra.mxu0 %v1246_v21  ;;  %v792_v5 = vmax.f32 %v760_v15, 0.0  ;;  %v794_v16 = vmax.f32 %v762_v20, 0.0  ;;  %v898_v17 = vand.u32 2147483647, %v866_v41  ;;  %v561_v32 = vsub.f32 %v1872_v60, %v1780_v58 }
  0x94   : >> { %v928_v19 = vsub.f32 1.0, %v896_v40  ;;  %v591_v18 = vand.u32 2147483647, %v559_v44  ;;  %v695_v45 = vsub.f32 %v1878_v31, %v1784_v59  ;;  %v697_v27 = vsub.f32 %v1880_v25, %v1784_v59 }
  0x95   : >> { %v824_v28 = vmul.f32 %v792_v5, %v656_v47  ;;  %v826_v43 = vmul.f32 %v794_v16, %v658_v23  ;;  %v930_v34 = vsub.f32 1.0, %v898_v17  ;;  %v593_v35 = vand.u32 2147483647, %v561_v32 }
  0x96   : >> { %v960_v54 = vmax.f32 %v928_v19, 0.0  ;;  %v623_v50 = vsub.f32 1.0, %v591_v18  ;;  %v727_v53 = vand.u32 2147483647, %v695_v45  ;;  %v729_v46 = vand.u32 2147483647, %v697_v27 }
  0x97   : >> { %v962_v11 = vmax.f32 %v930_v34, 0.0  ;;  %v625_v49 = vsub.f32 1.0, %v593_v35  ;;  %v863_v60 = vsub.f32 %v1888_v33, %v1812_v10  ;;  %v865_v61 = vsub.f32 %v1890_v42, %v1812_v10 }
  0x98   : >> { %v992_v31 = vmul.f32 %v960_v54, %v824_v28  ;;  %v655_v62 = vmax.f32 %v623_v50, 0.0  ;;  %v759_v30 = vsub.f32 1.0, %v727_v53  ;;  %v761_v25 = vsub.f32 1.0, %v729_v46 }
  0x99   : >> { %v994_v14 = vmul.f32 %v962_v11, %v826_v43  ;;  %v657_v22 = vmax.f32 %v625_v49, 0.0  ;;  %v895_v24 = vand.u32 2147483647, %v863_v60  ;;  %v897_v21 = vand.u32 2147483647, %v865_v61 }
  0x9a   : >> { %v791_v15 = vmax.f32 %v759_v30, 0.0  ;;  %v793_v20 = vmax.f32 %v761_v25, 0.0  ;;  %v2211_v41 = vfloor.f32 %v1854_v63  ;;  %v2212_v23 = vfloor.f32 %v1856_v0 }
  0x9b   : >> { %v1248_v33 = vpack.c.bf16 %v994_v14, %v992_v31  ;;  %v927_v44 = vsub.f32 1.0, %v895_v24  ;;  %v929_v5 = vsub.f32 1.0, %v897_v21  ;;  %v2215_v50 = vfloor.f32 %v1858_v1 }
  0x9c   : >> { %v422_v47 = vmul.f32 64.0, %v2211_v41  ;;  %v423_v40 = vmul.f32 64.0, %v2212_v23  ;;  %v2213_v42 = vmov %v2211_v41  ;;  %v823_v17 = vmul.f32 %v791_v15, %v655_v62 }
  0x9d   : >> { %v535_v16 = vadd.f32 %v1830_v29, %v2213_v42  ;;  %v825_v32 = vmul.f32 %v793_v20, %v657_v22  ;;  %1249 = vmatprep.subr.bf16.mxu0 %v1248_v33  ;;  %v959_v45 = vmax.f32 %v927_v44, 0.0  ;;  %v961_v27 = vmax.f32 %v929_v5, 0.0 }
  0x9e   : >> { %v438_v19 = vsub.f32 %v1839_v36, %v422_v47  ;;  %v439_v18 = vsub.f32 %v1842_v37, %v423_v40  ;;  %v2214_v28 = vmov %v2212_v23  ;;  %v424_v53 = vmul.f32 64.0, %v2215_v50 }
  0x9f   : >> { %v536_v43 = vadd.f32 %v1830_v29, %v2214_v28  ;;  %v564_v34 = vsub.f32 %v535_v16, %v1766_v55  ;;  %v563_v63 = vsub.f32 %v535_v16, %v1780_v58  ;;  %v991_v46 = vmul.f32 %v959_v45, %v823_v17 }
  0xa0   : >> { %v454_v35 = vadd.f32 0.5, %v438_v19  ;;  %v455_v54 = vadd.f32 0.5, %v439_v18  ;;  %v993_v36 = vmul.f32 %v961_v27, %v825_v32  ;;  %v2216_v25 = vfloor.f32 %v1860_v9 }
  0xa1   : >> { %v566_v37 = vsub.f32 %v536_v43, %v1766_v55  ;;  %v596_v11 = vand.u32 2147483647, %v564_v34  ;;  %v565_v0 = vsub.f32 %v536_v43, %v1780_v58  ;;  %v595_v61 = vand.u32 2147483647, %v563_v63 }
  0xa2   : >> { %v470_v49 = vmul.f32 0.125, %v454_v35  ;;  %v471_v60 = vmul.f32 0.125, %v455_v54  ;;  %v1250_v31 = vpack.c.bf16 %v993_v36, %v991_v46  ;;  %v425_v14 = vmul.f32 64.0, %v2216_v25 }
  0xa3   : >> { %v598_v62 = vand.u32 2147483647, %v566_v37  ;;  %v628_v30 = vsub.f32 1.0, %v596_v11  ;;  %v597_v21 = vand.u32 2147483647, %v565_v0  ;;  %v627_v15 = vsub.f32 1.0, %v595_v61 }
  0xa4   : >> { %v486_v22 = vfloor.f32 %v470_v49  ;;  %v487_v24 = vfloor.f32 %v471_v60  ;;  %1251 = vmatpush1.bf16.msra.mxu0 %v1250_v31  ;;  %v1941_v47 = vsub.f32 %v1845_v38, %v424_v53  ;;  %v1944_v23 = vsub.f32 %v1848_v39, %v425_v14 }
  0xa5   : >> { %v630_v20 = vsub.f32 1.0, %v598_v62  ;;  %v660_v41 = vmax.f32 %v628_v30, 0.0  ;;  %v629_v16 = vsub.f32 1.0, %v597_v21  ;;  %v659_v17 = vmax.f32 %v627_v15, 0.0 }
  0xa6   : >> { %v502_v40 = vmul.f32 8.0, %v486_v22  ;;  %v503_v33 = vmul.f32 8.0, %v487_v24  ;;  %v700_v44 = vsub.f32 %v486_v22, %v1772_v56  ;;  %v702_v5 = vsub.f32 %v487_v24, %v1772_v56 }
  0xa7   : >> { %v662_v42 = vmax.f32 %v630_v20, 0.0  ;;  %v699_v32 = vsub.f32 %v486_v22, %v1784_v59  ;;  %v661_v38 = vmax.f32 %v629_v16, 0.0  ;;  %v701_v34 = vsub.f32 %v487_v24, %v1784_v59 }
  0xa8   : >> { %v518_v45 = vsub.f32 %v438_v19, %v502_v40  ;;  %v519_v27 = vsub.f32 %v439_v18, %v503_v33  ;;  %v732_v28 = vand.u32 2147483647, %v700_v44  ;;  %v734_v43 = vand.u32 2147483647, %v702_v5 }
  0xa9   : >> { %v731_v39 = vand.u32 2147483647, %v699_v32  ;;  %v456_v35 = vadd.f32 0.5, %v1941_v47  ;;  %v733_v46 = vand.u32 2147483647, %v701_v34  ;;  %v457_v44 = vadd.f32 0.5, %v1944_v23 }
  0xaa   : >> { %v764_v54 = vsub.f32 1.0, %v732_v28  ;;  %v766_v63 = vsub.f32 1.0, %v734_v43  ;;  %v868_v50 = vsub.f32 %v518_v45, %v1776_v57  ;;  %v870_v53 = vsub.f32 %v519_v27, %v1776_v57 }
  0xab   : >> { %v763_v36 = vsub.f32 1.0, %v731_v39  ;;  %v867_v37 = vsub.f32 %v518_v45, %v1812_v10  ;;  %v869_v19 = vsub.f32 %v519_v27, %v1812_v10  ;;  %v765_v0 = vsub.f32 1.0, %v733_v46 }
  0xac   : >> { %v796_v18 = vmax.f32 %v764_v54, 0.0  ;;  %v798_v11 = vmax.f32 %v766_v63, 0.0  ;;  %v900_v49 = vand.u32 2147483647, %v868_v50  ;;  %v902_v60 = vand.u32 2147483647, %v870_v53 }
  0xad   : >> { %v795_v61 = vmax.f32 %v763_v36, 0.0  ;;  %v899_v31 = vand.u32 2147483647, %v867_v37  ;;  %v901_v62 = vand.u32 2147483647, %v869_v19  ;;  %v797_v24 = vmax.f32 %v765_v0, 0.0 }
  0xae   : >> { %v828_v30 = vmul.f32 %v796_v18, %v660_v41  ;;  %v830_v25 = vmul.f32 %v798_v11, %v662_v42  ;;  %v932_v14 = vsub.f32 1.0, %v900_v49  ;;  %v934_v22 = vsub.f32 1.0, %v902_v60 }
  0xaf   : >> { %v827_v21 = vmul.f32 %v795_v61, %v659_v17  ;;  %v931_v15 = vsub.f32 1.0, %v899_v31  ;;  %v933_v20 = vsub.f32 1.0, %v901_v62  ;;  %v472_v5 = vmul.f32 0.125, %v456_v35 }
  0xb0   : >> { %v964_v40 = vmax.f32 %v932_v14, 0.0  ;;  %v966_v33 = vmax.f32 %v934_v22, 0.0  ;;  %v829_v16 = vmul.f32 %v797_v24, %v661_v38  ;;  %v2217_v27 = vfloor.f32 %v1858_v1 }
  0xb1   : >> { %v963_v32 = vmax.f32 %v931_v15, 0.0  ;;  %v965_v45 = vmax.f32 %v933_v20, 0.0  ;;  %v473_v43 = vmul.f32 0.125, %v457_v44  ;;  %v488_v34 = vfloor.f32 %v472_v5 }
  0xb2   : >> { %v537_v28 = vadd.f32 %v1830_v29, %v2217_v27  ;;  %v996_v41 = vmul.f32 %v964_v40, %v828_v30  ;;  %v998_v42 = vmul.f32 %v966_v33, %v830_v25  ;;  %v2218_v54 = vfloor.f32 %v1860_v9 }
  0xb3   : >> { %v995_v39 = vmul.f32 %v963_v32, %v827_v21  ;;  %v997_v17 = vmul.f32 %v965_v45, %v829_v16  ;;  %v489_v38 = vfloor.f32 %v473_v43  ;;  %v504_v53 = vmul.f32 8.0, %v488_v34 }
  0xb4   : >> { %v538_v63 = vadd.f32 %v1830_v29, %v2218_v54  ;;  %v568_v50 = vsub.f32 %v537_v28, %v1766_v55  ;;  %v1252_v35 = vpack.c.bf16 %v998_v42, %v996_v41  ;;  %v704_v46 = vsub.f32 %v488_v34, %v1772_v56 }
  0xb5   : >> { %v1254_v1 = vpack.c.bf16 %v997_v17, %v995_v39  ;;  %v567_v19 = vsub.f32 %v537_v28, %v1780_v58  ;;  %v505_v18 = vmul.f32 8.0, %v489_v38  ;;  %v520_v11 = vsub.f32 %v1941_v47, %v504_v53 }
  0xb6   : >> { %v570_v36 = vsub.f32 %v538_v63, %v1766_v55  ;;  %v600_v37 = vand.u32 2147483647, %v568_v50  ;;  %1253 = vmatprep.subr.bf16.mxu0 %v1252_v35  ;;  %v706_v9 = vsub.f32 %v489_v38, %v1772_v56  ;;  %v736_v49 = vand.u32 2147483647, %v704_v46 }
  0xb7   : >> { %1255 = vmatpush1.bf16.msra.mxu0 %v1254_v1  ;;  %v569_v61 = vsub.f32 %v538_v63, %v1780_v58  ;;  %v599_v31 = vand.u32 2147483647, %v567_v19  ;;  %v521_v62 = vsub.f32 %v1944_v23, %v505_v18  ;;  %v872_v14 = vsub.f32 %v520_v11, %v1776_v57 }
  0xb8   : >> { %v602_v60 = vand.u32 2147483647, %v570_v36  ;;  %v632_v0 = vsub.f32 1.0, %v600_v37  ;;  %v738_v30 = vand.u32 2147483647, %v706_v9  ;;  %v768_v25 = vsub.f32 1.0, %v736_v49 }
  0xb9   : >> { %v601_v21 = vand.u32 2147483647, %v569_v61  ;;  %v631_v15 = vsub.f32 1.0, %v599_v31  ;;  %v874_v40 = vsub.f32 %v521_v62, %v1776_v57  ;;  %v904_v33 = vand.u32 2147483647, %v872_v14 }
  0xba   : >> { %v634_v22 = vsub.f32 1.0, %v602_v60  ;;  %v664_v24 = vmax.f32 %v632_v0, 0.0  ;;  %v770_v47 = vsub.f32 1.0, %v738_v30  ;;  %v800_v20 = vmax.f32 %v768_v25, 0.0 }
  0xbb   : >> { %v633_v5 = vsub.f32 1.0, %v601_v21  ;;  %v663_v16 = vmax.f32 %v631_v15, 0.0  ;;  %v703_v32 = vsub.f32 %v488_v34, %v1784_v59  ;;  %v906_v27 = vand.u32 2147483647, %v874_v40 }
  0xbc   : >> { %v666_v44 = vmax.f32 %v634_v22, 0.0  ;;  %v802_v45 = vmax.f32 %v770_v47, 0.0  ;;  %v832_v23 = vmul.f32 %v800_v20, %v664_v24  ;;  %v936_v28 = vsub.f32 1.0, %v904_v33 }
  0xbd   : >> { %v665_v41 = vmax.f32 %v633_v5, 0.0  ;;  %v705_v42 = vsub.f32 %v489_v38, %v1784_v59  ;;  %v735_v43 = vand.u32 2147483647, %v703_v32  ;;  %v871_v39 = vsub.f32 %v520_v11, %v1812_v10 }
  0xbe   : >> { %v834_v17 = vmul.f32 %v802_v45, %v666_v44  ;;  %v938_v54 = vsub.f32 1.0, %v906_v27  ;;  %v968_v63 = vmax.f32 %v936_v28, 0.0  ;;  %v873_v50 = vsub.f32 %v521_v62, %v1812_v10 }
  0xbf   : >> { %v737_v35 = vand.u32 2147483647, %v705_v42  ;;  %v767_v53 = vsub.f32 1.0, %v735_v43  ;;  %v903_v46 = vand.u32 2147483647, %v871_v39  ;;  %v2219_v34 = vcvt.s32.f32 %v1793_v2 }
  0xc0   : >> { %v970_v36 = vmax.f32 %v938_v54, 0.0  ;;  %v1000_v37 = vmul.f32 %v968_v63, %v832_v23  ;;  %v905_v19 = vand.u32 2147483647, %v873_v50  ;;  %v2220_v38 = vcvt.s32.f32 %v1796_v3 }
  0xc1   : >> { %v362_v1 = vadd.f32 %v1828_v26, %v2219_v34  ;;  %v769_v11 = vsub.f32 1.0, %v737_v35  ;;  %v799_v9 = vmax.f32 %v767_v53, 0.0  ;;  %v935_v49 = vsub.f32 1.0, %v903_v46 }
  0xc2   : >> { %v363_v18 = vadd.f32 %v1828_v26, %v2220_v38  ;;  %v1002_v0 = vmul.f32 %v970_v36, %v834_v17  ;;  %v937_v61 = vsub.f32 1.0, %v905_v19  ;;  %v2221_v62 = vcvt.s32.f32 %v1799_v4 }
  0xc3   : >> { %v378_v60 = vadd.f32 0.5, %v362_v1  ;;  %v801_v30 = vmax.f32 %v769_v11, 0.0  ;;  %v831_v25 = vmul.f32 %v799_v9, %v663_v16  ;;  %v967_v14 = vmax.f32 %v935_v49, 0.0 }
  0xc4   : >> { %v379_v31 = vadd.f32 0.5, %v363_v18  ;;  %v364_v2 = vadd.f32 %v1828_v26, %v2221_v62  ;;  %v1256_v24 = vpack.c.bf16 %v1002_v0, %v1000_v37  ;;  %v969_v21 = vmax.f32 %v937_v61, 0.0 }
  0xc5   : >> { %v394_v22 = vmul.f32 0.015625, %v378_v60  ;;  %v2222_v15 = vcvt.s32.f32 %v1802_v6  ;;  %v833_v20 = vmul.f32 %v801_v30, %v665_v41  ;;  %v999_v40 = vmul.f32 %v967_v14, %v831_v25 }
  0xc6   : >> { %v395_v3 = vmul.f32 0.015625, %v379_v31  ;;  %v380_v44 = vadd.f32 0.5, %v364_v2  ;;  %1257 = vmatprep.subr.bf16.mxu0 %v1256_v24  ;;  %v2223_v32 = vcvt.s32.f32 %v1805_v7  ;;  %v2224_v45 = vcvt.s32.f32 %v1808_v8 }
  0xc7   : >> { %v365_v47 = vadd.f32 %v1828_v26, %v2222_v15  ;;  %v410_v33 = vfloor.f32 %v394_v22  ;;  %v1001_v6 = vmul.f32 %v969_v21, %v833_v20 }
  0xc8   : >> { %v411_v5 = vfloor.f32 %v395_v3  ;;  %v1991_v16 = vadd.f32 %v1828_v26, %v2223_v32  ;;  %v1996_v23 = vadd.f32 %v1828_v26, %v2224_v45  ;;  %v1999_v41 = vmul.f32 0.015625, %v380_v44 }
  0xc9   : >> { %v381_v4 = vadd.f32 0.5, %v365_v47  ;;  %v426_v27 = vmul.f32 64.0, %v410_v33  ;;  %v539_v28 = vadd.f32 %v1830_v29, %v410_v33  ;;  %v1258_v17 = vpack.c.bf16 %v1001_v6, %v999_v40 }
  0xca   : >> { %v427_v42 = vmul.f32 64.0, %v411_v5  ;;  %v540_v43 = vadd.f32 %v1830_v29, %v411_v5  ;;  %v2005_v7 = vadd.f32 0.5, %v1991_v16  ;;  %v412_v46 = vfloor.f32 %v1999_v41 }
  0xcb   : >> { %v2002_v39 = vmul.f32 0.015625, %v381_v4  ;;  %v442_v54 = vsub.f32 %v362_v1, %v426_v27  ;;  %v572_v8 = vsub.f32 %v539_v28, %v1766_v55  ;;  %v571_v63 = vsub.f32 %v539_v28, %v1780_v58  ;;  %1259 = vmatpush1.bf16.msra.mxu0 %v1258_v17 }
  0xcc   : >> { %v443_v50 = vsub.f32 %v363_v18, %v427_v42  ;;  %v574_v35 = vsub.f32 %v540_v43, %v1766_v55  ;;  %v573_v53 = vsub.f32 %v540_v43, %v1780_v58  ;;  %v428_v9 = vmul.f32 64.0, %v412_v46 }
  0xcd   : >> { %v458_v34 = vadd.f32 0.5, %v442_v54  ;;  %v604_v36 = vand.u32 2147483647, %v572_v8  ;;  %v603_v37 = vand.u32 2147483647, %v571_v63  ;;  %v413_v19 = vfloor.f32 %v2002_v39 }
  0xce   : >> { %v459_v38 = vadd.f32 0.5, %v443_v50  ;;  %v606_v11 = vand.u32 2147483647, %v574_v35  ;;  %v605_v1 = vand.u32 2147483647, %v573_v53  ;;  %v444_v30 = vsub.f32 %v364_v2, %v428_v9 }
  0xcf   : >> { %v474_v49 = vmul.f32 0.125, %v458_v34  ;;  %v636_v18 = vsub.f32 1.0, %v604_v36  ;;  %v635_v60 = vsub.f32 1.0, %v603_v37  ;;  %v429_v0 = vmul.f32 64.0, %v413_v19 }
  0xd0   : >> { %v475_v61 = vmul.f32 0.125, %v459_v38  ;;  %v638_v31 = vsub.f32 1.0, %v606_v11  ;;  %v637_v62 = vsub.f32 1.0, %v605_v1  ;;  %v460_v20 = vadd.f32 0.5, %v444_v30 }
  0xd1   : >> { %v490_v25 = vfloor.f32 %v474_v49  ;;  %v668_v14 = vmax.f32 %v636_v18, 0.0  ;;  %v667_v22 = vmax.f32 %v635_v60, 0.0  ;;  %v445_v24 = vsub.f32 %v365_v47, %v429_v0 }
  0xd2   : >> { %v491_v21 = vfloor.f32 %v475_v61  ;;  %v670_v3 = vmax.f32 %v638_v31, 0.0  ;;  %v669_v15 = vmax.f32 %v637_v62, 0.0  ;;  %v476_v2 = vmul.f32 0.125, %v460_v20 }
  0xd3   : >> { %v506_v40 = vmul.f32 8.0, %v490_v25  ;;  %v708_v33 = vsub.f32 %v490_v25, %v1772_v56  ;;  %v707_v44 = vsub.f32 %v490_v25, %v1784_v59  ;;  %v461_v5 = vadd.f32 0.5, %v445_v24 }
  0xd4   : >> { %v507_v4 = vmul.f32 8.0, %v491_v21  ;;  %v710_v32 = vsub.f32 %v491_v21, %v1772_v56  ;;  %v709_v45 = vsub.f32 %v491_v21, %v1784_v59  ;;  %v2021_v8 = vfloor.f32 %v476_v2 }
  0xd5   : >> { %v522_v6 = vsub.f32 %v442_v54, %v506_v40  ;;  %v740_v27 = vand.u32 2147483647, %v708_v33  ;;  %v739_v28 = vand.u32 2147483647, %v707_v44  ;;  %v477_v47 = vmul.f32 0.125, %v461_v5 }
  0xd6   : >> { %v523_v42 = vsub.f32 %v443_v50, %v507_v4  ;;  %v742_v43 = vand.u32 2147483647, %v710_v32  ;;  %v741_v17 = vand.u32 2147483647, %v709_v45  ;;  %v508_v32 = vmul.f32 8.0, %v2021_v8 }
  0xd7   : >> { %v772_v63 = vsub.f32 1.0, %v740_v27  ;;  %v876_v35 = vsub.f32 %v522_v6, %v1776_v57  ;;  %v771_v53 = vsub.f32 1.0, %v739_v28  ;;  %v875_v34 = vsub.f32 %v522_v6, %v1812_v10 }
  0xd8   : >> { %v774_v36 = vsub.f32 1.0, %v742_v43  ;;  %v878_v37 = vsub.f32 %v523_v42, %v1776_v57  ;;  %v773_v38 = vsub.f32 1.0, %v741_v17  ;;  %v877_v54 = vsub.f32 %v523_v42, %v1812_v10 }
  0xd9   : >> { %v804_v11 = vmax.f32 %v772_v63, 0.0  ;;  %v908_v1 = vand.u32 2147483647, %v876_v35  ;;  %v803_v9 = vmax.f32 %v771_v53, 0.0  ;;  %v907_v50 = vand.u32 2147483647, %v875_v34 }
  0xda   : >> { %v806_v49 = vmax.f32 %v774_v36, 0.0  ;;  %v910_v18 = vand.u32 2147483647, %v878_v37  ;;  %v805_v60 = vmax.f32 %v773_v38, 0.0  ;;  %v909_v0 = vand.u32 2147483647, %v877_v54 }
  0xdb   : >> { %v836_v61 = vmul.f32 %v804_v11, %v668_v14  ;;  %v940_v31 = vsub.f32 1.0, %v908_v1  ;;  %v835_v62 = vmul.f32 %v803_v9, %v667_v22  ;;  %v939_v25 = vsub.f32 1.0, %v907_v50 }
  0xdc   : >> { %v838_v21 = vmul.f32 %v806_v49, %v670_v3  ;;  %v942_v20 = vsub.f32 1.0, %v910_v18  ;;  %v837_v40 = vmul.f32 %v805_v60, %v669_v15  ;;  %v941_v33 = vsub.f32 1.0, %v909_v0 }
  0xdd   : >> { %v972_v44 = vmax.f32 %v940_v31, 0.0  ;;  %v971_v5 = vmax.f32 %v939_v25, 0.0  ;;  %v493_v4 = vfloor.f32 %v477_v47  ;;  %v541_v6 = vadd.f32 %v1830_v29, %v412_v46 }
  0xde   : >> { %v974_v45 = vmax.f32 %v942_v20, 0.0  ;;  %v973_v2 = vmax.f32 %v941_v33, 0.0  ;;  %v542_v14 = vadd.f32 %v1830_v29, %v413_v19  ;;  %v524_v15 = vsub.f32 %v444_v30, %v508_v32 }
  0xdf   : >> { %v1004_v22 = vmul.f32 %v972_v44, %v836_v61  ;;  %v1003_v3 = vmul.f32 %v971_v5, %v835_v62  ;;  %v509_v27 = vmul.f32 8.0, %v493_v4  ;;  %v576_v47 = vsub.f32 %v541_v6, %v1766_v55 }
  0xe0   : >> { %v1006_v28 = vmul.f32 %v974_v45, %v838_v21  ;;  %v1005_v42 = vmul.f32 %v973_v2, %v837_v40  ;;  %v578_v43 = vsub.f32 %v542_v14, %v1766_v55  ;;  %v712_v41 = vsub.f32 %v2021_v8, %v1772_v56 }
  0xe1   : >> { %v525_v17 = vsub.f32 %v445_v24, %v509_v27  ;;  %v714_v46 = vsub.f32 %v493_v4, %v1772_v56  ;;  %v880_v39 = vsub.f32 %v524_v15, %v1776_v57  ;;  %v608_v35 = vand.u32 2147483647, %v576_v47 }
  0xe2   : >> { %v1260_v63 = vpack.c.bf16 %v1006_v28, %v1004_v22  ;;  %v1262_v19 = vpack.c.bf16 %v1005_v42, %v1003_v3  ;;  %v610_v53 = vand.u32 2147483647, %v578_v43  ;;  %v744_v34 = vand.u32 2147483647, %v712_v41 }
  0xe3   : >> { %v746_v30 = vand.u32 2147483647, %v714_v46  ;;  %v882_v36 = vsub.f32 %v525_v17, %v1776_v57  ;;  %v912_v37 = vand.u32 2147483647, %v880_v39  ;;  %v640_v38 = vsub.f32 1.0, %v608_v35 }
  0xe4   : >> { %1261 = vmatprep.subr.bf16.mxu0 %v1260_v63  ;;  %v642_v54 = vsub.f32 1.0, %v610_v53  ;;  %v575_v24 = vsub.f32 %v541_v6, %v1780_v58  ;;  %v577_v11 = vsub.f32 %v542_v14, %v1780_v58  ;;  %v776_v1 = vsub.f32 1.0, %v744_v34 }
  0xe5   : >> { %1263 = vmatpush1.bf16.msra.mxu0 %v1262_v19  ;;  %v778_v9 = vsub.f32 1.0, %v746_v30  ;;  %v914_v50 = vand.u32 2147483647, %v882_v36  ;;  %v944_v49 = vsub.f32 1.0, %v912_v37  ;;  %v672_v18 = vmax.f32 %v640_v38, 0.0 }
  0xe6   : >> { %v674_v60 = vmax.f32 %v642_v54, 0.0  ;;  %v607_v0 = vand.u32 2147483647, %v575_v24  ;;  %v609_v61 = vand.u32 2147483647, %v577_v11  ;;  %v808_v31 = vmax.f32 %v776_v1, 0.0 }
  0xe7   : >> { %v810_v62 = vmax.f32 %v778_v9, 0.0  ;;  %v946_v25 = vsub.f32 1.0, %v914_v50  ;;  %v976_v21 = vmax.f32 %v944_v49, 0.0  ;;  %v711_v33 = vsub.f32 %v2021_v8, %v1784_v59 }
  0xe8   : >> { %v639_v20 = vsub.f32 1.0, %v607_v0  ;;  %v641_v40 = vsub.f32 1.0, %v609_v61  ;;  %v713_v44 = vsub.f32 %v493_v4, %v1784_v59  ;;  %v840_v5 = vmul.f32 %v808_v31, %v672_v18 }
  0xe9   : >> { %v842_v32 = vmul.f32 %v810_v62, %v674_v60  ;;  %v978_v45 = vmax.f32 %v946_v25, 0.0  ;;  %v879_v2 = vsub.f32 %v524_v15, %v1812_v10  ;;  %v743_v22 = vand.u32 2147483647, %v711_v33 }
  0xea   : >> { %v671_v6 = vmax.f32 %v639_v20, 0.0  ;;  %v673_v14 = vmax.f32 %v641_v40, 0.0  ;;  %v745_v3 = vand.u32 2147483647, %v713_v44  ;;  %v1008_v27 = vmul.f32 %v976_v21, %v840_v5 }
  0xeb   : >> { %v1010_v28 = vmul.f32 %v978_v45, %v842_v32  ;;  %v881_v42 = vsub.f32 %v525_v17, %v1812_v10  ;;  %v911_v47 = vand.u32 2147483647, %v879_v2  ;;  %v775_v43 = vsub.f32 1.0, %v743_v22 }
  0xec   : >> { %v777_v41 = vsub.f32 1.0, %v745_v3  ;;  %v383_v8 = vadd.f32 0.5, %v1996_v23  ;;  %v398_v4 = vmul.f32 0.015625, %v2005_v7  ;;  %v2225_v15 = vcvt.s32.f32 %v1815_v12 }
  0xed   : >> { %v1264_v46 = vpack.c.bf16 %v1010_v28, %v1008_v27  ;;  %v913_v39 = vand.u32 2147483647, %v881_v42  ;;  %v943_v63 = vsub.f32 1.0, %v911_v47  ;;  %v807_v35 = vmax.f32 %v775_v43, 0.0 }
  0xee   : >> { %v368_v19 = vadd.f32 %v1828_v26, %v2225_v15  ;;  %v809_v53 = vmax.f32 %v777_v41, 0.0  ;;  %v399_v34 = vmul.f32 0.015625, %v383_v8  ;;  %v414_v30 = vfloor.f32 %v398_v4 }
  0xef   : >> { %1265 = vmatprep.subr.bf16.mxu0 %v1264_v46  ;;  %v945_v17 = vsub.f32 1.0, %v913_v39  ;;  %v975_v36 = vmax.f32 %v943_v63, 0.0  ;;  %v2226_v37 = vcvt.s32.f32 %v1818_v13  ;;  %v839_v7 = vmul.f32 %v807_v35, %v671_v6 }
  0xf0   : >> { %v384_v54 = vadd.f32 0.5, %v368_v19  ;;  %v841_v24 = vmul.f32 %v809_v53, %v673_v14  ;;  %v415_v11 = vfloor.f32 %v399_v34  ;;  %v430_v1 = vmul.f32 64.0, %v414_v30 }
  0xf1   : >> { %v369_v38 = vadd.f32 %v1828_v26, %v2226_v37  ;;  %v977_v9 = vmax.f32 %v945_v17, 0.0  ;;  %v543_v12 = vadd.f32 %v1830_v29, %v414_v30  ;;  %v1007_v18 = vmul.f32 %v975_v36, %v839_v7 }
  0xf2   : >> { %v2057_v49 = vmul.f32 0.015625, %v384_v54  ;;  %v431_v60 = vmul.f32 64.0, %v415_v11  ;;  %v446_v0 = vsub.f32 %v1991_v16, %v430_v1  ;;  %v544_v61 = vadd.f32 %v1830_v29, %v415_v11 }
  0xf3   : >> { %v385_v50 = vadd.f32 0.5, %v369_v38  ;;  %v1009_v13 = vmul.f32 %v977_v9, %v841_v24  ;;  %v580_v26 = vsub.f32 %v543_v12, %v1766_v55  ;;  %v579_v31 = vsub.f32 %v543_v12, %v1780_v58 }
  0xf4   : >> { %v447_v25 = vsub.f32 %v1996_v23, %v431_v60  ;;  %v462_v21 = vadd.f32 0.5, %v446_v0  ;;  %v582_v20 = vsub.f32 %v544_v61, %v1766_v55  ;;  %v581_v40 = vsub.f32 %v544_v61, %v1780_v58 }
  0xf5   : >> { %v2063_v62 = vmul.f32 0.015625, %v385_v50  ;;  %v1266_v33 = vpack.c.bf16 %v1009_v13, %v1007_v18  ;;  %v612_v44 = vand.u32 2147483647, %v580_v26  ;;  %v611_v5 = vand.u32 2147483647, %v579_v31 }
  0xf6   : >> { %v416_v16 = vfloor.f32 %v2057_v49  ;;  %v463_v32 = vadd.f32 0.5, %v447_v25  ;;  %v478_v45 = vmul.f32 0.125, %v462_v21  ;;  %v614_v2 = vand.u32 2147483647, %v582_v20 }
  0xf7   : >> { %v613_v6 = vand.u32 2147483647, %v581_v40  ;;  %1267 = vmatpush1.bf16.msra.mxu0 %v1266_v33  ;;  %v644_v14 = vsub.f32 1.0, %v612_v44  ;;  %v643_v22 = vsub.f32 1.0, %v611_v5  ;;  %v417_v3 = vfloor.f32 %v2063_v62 }
  0xf8   : >> { %v432_v23 = vmul.f32 64.0, %v416_v16  ;;  %v479_v27 = vmul.f32 0.125, %v463_v32  ;;  %v494_v28 = vfloor.f32 %v478_v45  ;;  %v646_v42 = vsub.f32 1.0, %v614_v2 }
  0xf9   : >> { %v645_v47 = vsub.f32 1.0, %v613_v6  ;;  %v676_v43 = vmax.f32 %v644_v14, 0.0  ;;  %v675_v41 = vmax.f32 %v643_v22, 0.0  ;;  %v433_v8 = vmul.f32 64.0, %v417_v3 }
  0xfa   : >> { %v448_v4 = vsub.f32 %v368_v19, %v432_v23  ;;  %v495_v46 = vfloor.f32 %v479_v27  ;;  %v510_v39 = vmul.f32 8.0, %v494_v28  ;;  %v678_v63 = vmax.f32 %v646_v42, 0.0 }
  0xfb   : >> { %v716_v15 = vsub.f32 %v494_v28, %v1772_v56  ;;  %v677_v35 = vmax.f32 %v645_v47, 0.0  ;;  %v715_v53 = vsub.f32 %v494_v28, %v1784_v59  ;;  %v449_v34 = vsub.f32 %v369_v38, %v433_v8 }
  0xfc   : >> { %v464_v30 = vadd.f32 0.5, %v448_v4  ;;  %v511_v17 = vmul.f32 8.0, %v495_v46  ;;  %v526_v36 = vsub.f32 %v446_v0, %v510_v39  ;;  %v718_v37 = vsub.f32 %v495_v46, %v1772_v56 }
  0xfd   : >> { %v748_v54 = vand.u32 2147483647, %v716_v15  ;;  %v717_v7 = vsub.f32 %v495_v46, %v1784_v59  ;;  %v747_v24 = vand.u32 2147483647, %v715_v53  ;;  %v465_v11 = vadd.f32 0.5, %v449_v34 }
  0xfe   : >> { %v480_v19 = vmul.f32 0.125, %v464_v30  ;;  %v527_v1 = vsub.f32 %v447_v25, %v511_v17  ;;  %v750_v9 = vand.u32 2147483647, %v718_v37  ;;  %v884_v50 = vsub.f32 %v526_v36, %v1776_v57 }
  0xff   : >> { %v780_v12 = vsub.f32 1.0, %v748_v54  ;;  %v749_v18 = vand.u32 2147483647, %v717_v7  ;;  %v779_v60 = vsub.f32 1.0, %v747_v24  ;;  %v883_v38 = vsub.f32 %v526_v36, %v1812_v10 }
 0x100   : >> { %v481_v61 = vmul.f32 0.125, %v465_v11  ;;  %v782_v13 = vsub.f32 1.0, %v750_v9  ;;  %v886_v26 = vsub.f32 %v527_v1, %v1776_v57  ;;  %v916_v31 = vand.u32 2147483647, %v884_v50 }
 0x101   : >> { %v812_v0 = vmax.f32 %v780_v12, 0.0  ;;  %v781_v21 = vsub.f32 1.0, %v749_v18  ;;  %v811_v20 = vmax.f32 %v779_v60, 0.0  ;;  %v885_v40 = vsub.f32 %v527_v1, %v1812_v10 }
 0x102   : >> { %v915_v33 = vand.u32 2147483647, %v883_v38  ;;  %v814_v25 = vmax.f32 %v782_v13, 0.0  ;;  %v918_v5 = vand.u32 2147483647, %v886_v26  ;;  %v948_v32 = vsub.f32 1.0, %v916_v31 }
 0x103   : >> { %v844_v44 = vmul.f32 %v812_v0, %v676_v43  ;;  %v813_v45 = vmax.f32 %v781_v21, 0.0  ;;  %v843_v2 = vmul.f32 %v811_v20, %v675_v41  ;;  %v917_v6 = vand.u32 2147483647, %v885_v40 }
 0x104   : >> { %v947_v14 = vsub.f32 1.0, %v915_v33  ;;  %v846_v22 = vmul.f32 %v814_v25, %v678_v63  ;;  %v950_v23 = vsub.f32 1.0, %v918_v5  ;;  %v980_v27 = vmax.f32 %v948_v32, 0.0 }
 0x105   : >> { %v496_v28 = vfloor.f32 %v480_v19  ;;  %v845_v42 = vmul.f32 %v813_v45, %v677_v35  ;;  %v949_v47 = vsub.f32 1.0, %v917_v6  ;;  %v497_v46 = vfloor.f32 %v481_v61 }
 0x106   : >> { %v979_v8 = vmax.f32 %v947_v14, 0.0  ;;  %v982_v39 = vmax.f32 %v950_v23, 0.0  ;;  %v1012_v15 = vmul.f32 %v980_v27, %v844_v44  ;;  %v545_v43 = vadd.f32 %v1830_v29, %v416_v16 }
 0x107   : >> { %v512_v53 = vmul.f32 8.0, %v496_v28  ;;  %v981_v30 = vmax.f32 %v949_v47, 0.0  ;;  %v513_v41 = vmul.f32 8.0, %v497_v46  ;;  %v546_v63 = vadd.f32 %v1830_v29, %v417_v3 }
 0x108   : >> { %v1011_v17 = vmul.f32 %v979_v8, %v843_v2  ;;  %v1014_v36 = vmul.f32 %v982_v39, %v846_v22  ;;  %v584_v35 = vsub.f32 %v545_v43, %v1766_v55  ;;  %v720_v54 = vsub.f32 %v496_v28, %v1772_v56 }
 0x109   : >> { %v528_v37 = vsub.f32 %v448_v4, %v512_v53  ;;  %v1013_v7 = vmul.f32 %v981_v30, %v845_v42  ;;  %v529_v24 = vsub.f32 %v449_v34, %v513_v41  ;;  %v586_v11 = vsub.f32 %v546_v63, %v1766_v55 }
 0x10a   : >> { %v722_v49 = vsub.f32 %v497_v46, %v1772_v56  ;;  %v1268_v16 = vpack.c.bf16 %v1014_v36, %v1012_v15  ;;  %v616_v19 = vand.u32 2147483647, %v584_v35  ;;  %v752_v1 = vand.u32 2147483647, %v720_v54 }
 0x10b   : >> { %v888_v9 = vsub.f32 %v528_v37, %v1776_v57  ;;  %v1270_v62 = vpack.c.bf16 %v1013_v7, %v1011_v17  ;;  %v618_v12 = vand.u32 2147483647, %v586_v11  ;;  %v890_v3 = vsub.f32 %v529_v24, %v1776_v57  ;;  %v313_v7 = vld [vmem:[%s312_s0] sm:$0xf] }
 0x10c   : >> { %v754_v29 = vand.u32 2147483647, %v722_v49  ;;  %1269 = vmatprep.subr.bf16.mxu0 %v1268_v16  ;;  %v648_v4 = vsub.f32 1.0, %v616_v19  ;;  %v784_v50 = vsub.f32 1.0, %v752_v1  ;;  %v583_v34 = vsub.f32 %v545_v43, %v1780_v58 }
 0x10d   : >> { %v920_v18 = vand.u32 2147483647, %v888_v9  ;;  %1271 = vmatpush1.bf16.msra.mxu0 %v1270_v62  ;;  %v650_v55 = vsub.f32 1.0, %v618_v12  ;;  %v922_v56 = vand.u32 2147483647, %v890_v3  ;;  %v585_v38 = vsub.f32 %v546_v63, %v1780_v58 }
 0x10e   : >> { %v786_v60 = vsub.f32 1.0, %v754_v29  ;;  %v680_v61 = vmax.f32 %v648_v4, 0.0  ;;  %v816_v13 = vmax.f32 %v784_v50, 0.0  ;;  %v615_v26 = vand.u32 2147483647, %v583_v34 }
 0x10f   : >> { %v952_v0 = vsub.f32 1.0, %v920_v18  ;;  %v682_v31 = vmax.f32 %v650_v55, 0.0  ;;  %v954_v20 = vsub.f32 1.0, %v922_v56  ;;  %v617_v57 = vand.u32 2147483647, %v585_v38 }
 0x110   : >> { %v818_v21 = vmax.f32 %v786_v60, 0.0  ;;  %v848_v40 = vmul.f32 %v816_v13, %v680_v61  ;;  %v647_v25 = vsub.f32 1.0, %v615_v26  ;;  %v719_v44 = vsub.f32 %v496_v28, %v1784_v59 }
 0x111   : >> { %v984_v33 = vmax.f32 %v952_v0, 0.0  ;;  %v986_v32 = vmax.f32 %v954_v20, 0.0  ;;  %v649_v45 = vsub.f32 1.0, %v617_v57  ;;  %v721_v2 = vsub.f32 %v497_v46, %v1784_v59 }
 0x112   : >> { %v850_v5 = vmul.f32 %v818_v21, %v682_v31  ;;  %v751_v6 = vand.u32 2147483647, %v719_v44  ;;  %v887_v14 = vsub.f32 %v528_v37, %v1812_v10  ;;  %v889_v27 = vsub.f32 %v529_v24, %v1812_v10 }
 0x113   : >> { %v1016_v58 = vmul.f32 %v984_v33, %v848_v40  ;;  %v753_v23 = vand.u32 2147483647, %v721_v2  ;;  %v679_v42 = vmax.f32 %v647_v25, 0.0  ;;  %v681_v15 = vmax.f32 %v649_v45, 0.0 }
 0x114   : >> { %v1018_v22 = vmul.f32 %v986_v32, %v850_v5  ;;  %v783_v47 = vsub.f32 1.0, %v751_v6  ;;  %v919_v8 = vand.u32 2147483647, %v887_v14  ;;  %v921_v53 = vand.u32 2147483647, %v889_v27 }
 0x115   : >> { %v785_v28 = vsub.f32 1.0, %v753_v23  ;;  %v1568_v43 = vmov 0.0  }
 0x116   : >> { %v1272_v39 = vpack.c.bf16 %v1018_v22, %v1016_v58  ;;  %1083 = vmatprep.mubr.f32.mxu0 %v1568_v43  ;;  %v815_v59 = vmax.f32 %v783_v47, 0.0  ;;  %v951_v46 = vsub.f32 1.0, %v919_v8  ;;  %v953_v17 = vsub.f32 1.0, %v921_v53 }
 0x117   : >> { %v817_v30 = vmax.f32 %v785_v28, 0.0 }
 0x118   : >> { %1273 = vmatprep.subr.bf16.mxu0 %v1272_v39  ;;  %v847_v41 = vmul.f32 %v815_v59, %v679_v42  ;;  %v983_v63 = vmax.f32 %v951_v46, 0.0  ;;  %v985_v36 = vmax.f32 %v953_v17, 0.0 }
 0x119   : >> { %v849_v10 = vmul.f32 %v817_v30, %v681_v15 }
 0x11a   : >> { %v1015_v37 = vmul.f32 %v983_v63, %v847_v41 }
 0x11b   : >> { %v1017_v35 = vmul.f32 %v985_v36, %v849_v10 }
 0x11d   : >> { %v1274_v54 = vpack.c.bf16 %v1017_v35, %v1015_v37 }
 0x11f   : >> { %1275 = vmatpush1.bf16.msra.mxu0 %v1274_v54 }
 0x122   : >> { %1084 = vmatmul.mubr.f32.vlgmr.msra.gmra.mrb[0].mxu0 %v313_v7 }
 0x1f3   : > { %305 = sbr.rel (!%p302_p2) target bundleno = 101 (0x65), region = 76 }
 0x1f5   : >> { %v1085_v24 = vpop.f32.mrb[0].mxu0 }
 0x1f6   : >> { %v1090_v11 = vadd.f32 %v1551_v52, %v1085_v24   ;;  %v1087_v49 = vpop.f32.mrb[1].mxu0 }
 0x1f7   : >> { %v1091_v16 = vadd.f32 %v1547_v51, %v1087_v49  }
 0x1f8   : >> { %v2228_v52 = vmov %v1090_v11  ;;  %v2230_v50 = vmov (%p302_p2), %v1090_v11 }
 0x1f9   : >> { %v2227_v51 = vmov %v1091_v16  ;;  %v2229_v49 = vmov (%p302_p2), %v1091_v16 }
 0x1fa PF: > { %v1094_v52 = vcombine.low %v1563_v50, %v1559_v49  ;;  %s1239_s29 = sshll.u32 %s1531_s9, 2  ;;  %s1114_s10 = sshll.u32 %s193_s11, 4  ;;  %v1563_v50 = vphi %v1741_v50, %v2230_v50   ;;  %v1559_v49 = vphi %v1739_v49, %v2229_v49   ;;  %s2125_s10 = int_to_ptr.vmem [resolvable:$true] %s1114_s10 }
 0x1fb   : > { %s1110_s15 = sadd.s32 %s1239_s29, %s1682_s25  ;;  %s2231_s24 = sand.u32 1, %s1519_s7  }
 0x1fc   : > { %1096 = vst [vmem:[%s193_s11] sm:$0xff] %v1094_v52  ;;  %s1240_s30 = sshll.u32 %s1110_s15, 6  ;;  %s1098_s13 = scalar_lea.sflag [#allocation7], %s2231_s24 }
 0x1fd   : > { %s1112_s16 = scalar_lea.hbm %s2179_s5, %s1240_s30  ;;  %s1427_s14 = scalar_lea.vmem %s2125_s10, 128 }
 0x1fe   : > { %p1428_p3 = scmp.ne.s32.totalorder %s2125_s10, %s1427_s14  ;;  %s1569_s9 = smov [#allocation6]  }
 0x1ff   : > { %s1431_s25 = sshll.u32 %s1569_s9, 4  ;;  %s1432_s25 = int_to_ptr.vmem [resolvable:$false] %s1431_s25 }
 0x200   : > { %p1429_p5 = pnand %p1428_p3, %p1660_p4  ;;  %s1433_s26 = scalar_lea.vmem %s1432_s25, 256 }
 0x201   : > { %p1434_p7 = scmp.lt.s32.totalorder %s2125_s10, %s1432_s25  ;;  %p1435_p8 = scmp.lt.s32.totalorder %s1433_s26, %s1427_s14 }
 0x202   : > { %p1430_p6 = pneg %p1429_p5 }
 0x203   : > { %p1436_p10 = por %p1435_p8, %p1434_p7 }
 0x205   : > { %p1437_p11 = pnand %p1436_p10, %p1430_p6 }
 0x207   : > { %1440 = shalt.err (!%p1437_p11)
}
 0x208   : > { %s1441_s11 = scalar_lea.hbm %s1112_s16, 128  ;;  %s1445_s21 = scalar_lea.hbm %s2179_s5, 512 }
 0x209   : > { %p1442_p12 = scmp.ne.s32.totalorder %s1112_s16, %s1441_s11  ;;  %p1446_p1 = scmp.lt.u32.totalorder %s1112_s16, %s2179_s5 }
 0x20a   : > { %p1447_p2 = scmp.lt.u32.totalorder %s1445_s21, %s1441_s11  ;;  %p1449_p5 = scmp.lt.u32.totalorder %s1441_s11, %s1112_s16 }
 0x20b   : > { %p1443_p13 = pnand %p1442_p12, %p1660_p4 }
 0x20c   : > { %p1448_p3 = por %p1447_p2, %p1446_p1 }
 0x20d   : > { %p1444_p0 = pneg %p1443_p13 }
 0x20e   : > { %p1450_p7 = por %p1449_p5, %p1448_p3 }
 0x210   : > { %p1451_p6 = pnand %p1450_p7, %p1444_p0 }
 0x212   : > { %1454 = shalt.err (!%p1451_p6)
}
 0x213   : > { %1276 = dma.vmem_to_hbm [thread:$0]  (%p1660_p4), %s2125_s10, 128, %s1112_s16, %s1098_s13  }
 0x214 PF: > { %p1282_p8 = scmp.ge.s32.totalorder %s1543_s12, 2  ;;  %s1126_s28 = sand.u32 1, %s1515_s6  }
 0x215   : > { %s1127_s0 = scalar_lea.sflag [#allocation7], %s1126_s28 }
 0x216   : > { %p1279_p10 = pnand %p1282_p8, %p1669_p9 }
 0x218   : > { %1510 = dma.done.wait (!%p1279_p10), %s1127_s0, 128  }
 0x219   : > { %1512 = vsyncadd (!%p1279_p10), %s1127_s0, 4294967168  ;;  %s32_s12 = sadd.s32 1, %s1543_s12   ;;  %s2232_s8 = sld [smem:[#allocation10_spill]] }
 0x21a   : > { %p29_p11 = scmp.ge.s32.totalorder %s32_s12, 6   ;;  %s2233_s9 = sld [smem:[#allocation11_spill]] }
 0x21b   : > { %s2234_s10 = sld [smem:[#allocation12_spill]]  ;;  %s2235_s11 = sld [smem:[#allocation13_spill]] }
 0x21c   : > { %s2236_s6 = smov %s1519_s7  ;;  %s2237_s7 = smov %s1523_s2 }
 0x21d   : > { %s2238_s2 = smov %s1678_s23  ;;  %31 = sbr.rel (!%p29_p11) target bundleno = 40 (0x28), region = 87 }
 0x224   :  { %1132 = vsyncpa [#allocation7], 1 }
 0x225   :  { %1134 = vsyncpa [#allocation7 + $0x1], 1 }

</bundles_post_ra>
